<compile_context>
chip_gen: v6e
topology: v6e:2x2x1
jax: 0.10.0
libtpu: 0.0.40
codegen_flags: <defaults>
</compile_context>

<pallas_src>
import functools

import numpy as np
import jax
import jax.numpy as jnp
from jax import lax
from jax.experimental import pallas as pl
from jax.experimental.pallas import tpu as pltpu


# --------------------------------------------------------------------------
# Per-generation tuning knobs
# --------------------------------------------------------------------------
def _chip_budget():
    """(pointwise row-tile cap, scoped-VMEM limit, depthwise scratch dtype).

    v5e/v6e: 128 MiB VMEM -> larger row tiles + higher scoped limit.
    v7x / unknown: 64 MiB per TC -> stay conservative (512 rows / 32 MiB).
    v5e has no bf16 VALU -> keep the depthwise padded scratch in f32 there;
    None means "use the (bf16) activation dtype".
    """
    try:
        kind = jax.devices()[0].device_kind.lower()
    except Exception:
        kind = ""
    if "v5" in kind:
        return 1024, 64 * 1024 * 1024, jnp.float32
    if "v6" in kind:
        return 1024, 64 * 1024 * 1024, None
    return 512, 32 * 1024 * 1024, None


# --------------------------------------------------------------------------
# Pallas kernels
# --------------------------------------------------------------------------
def _pointwise_kernel(*refs, relu, add_res):
    """1x1 conv tile as a bf16 MXU matmul with fused shift (+ReLU) (+residual).

    x (TN, Ci) tile, w (Ci, Co) resident, shift (1, Co) resident,
    optional residual (TN, Co) tile.  Ci/Co are the pixel-packed widths.
    """
    if add_res:
        x_ref, w_ref, t_ref, r_ref, o_ref = refs
    else:
        x_ref, w_ref, t_ref, o_ref = refs

    h = jnp.dot(x_ref[...].astype(jnp.bfloat16), w_ref[...],
                preferred_element_type=jnp.float32)
    h = h + t_ref[...]                       # folded (bias*scale + shift)
    if relu:
        h = jnp.maximum(h, 0.0)
    if add_res:
        h = h + r_ref[...].astype(jnp.float32)
    o_ref[...] = h.astype(o_ref.dtype)


def _depthwise_kernel(x_ref, w_ref, t_ref, o_ref, pad_ref,
                      *, k, stride, pad, H, W, Hout, Wout, hs):
    """Depthwise k x k conv on one (batch, channel-tile) block.

    The zero-padded input tile is built once in a VMEM scratch; the conv then
    runs strip-by-strip over the output rows (fori_loop, slicing the scratch
    Ref per tap) so the per-iteration live values stay bounded instead of
    materializing the whole padded tile and accumulator (spill-bound before).
    Taps run at stride 1 along W; stride>1 is a single subsample per strip.
    """
    C = x_ref.shape[3]
    Wp = W + 2 * pad
    Wfull = Wp - k + 1                     # stride-1 output width
    span = (hs - 1) * stride + 1           # input rows feeding one strip per kh

    # Zero only the border strips of the scratch, then copy the interior.
    if pad > 0:
        zrow = jnp.zeros((1, pad, Wp, C), pad_ref.dtype)
        pad_ref[:, :pad, :, :] = zrow
        pad_ref[:, pad + H:, :, :] = zrow
        zcol = jnp.zeros((1, H, pad, C), pad_ref.dtype)
        pad_ref[:, pad:pad + H, :pad, :] = zcol
        pad_ref[:, pad:pad + H, pad + W:, :] = zcol
    pad_ref[:, pad:pad + H, pad:pad + W, :] = x_ref[...].astype(pad_ref.dtype)

    w = w_ref[...].astype(jnp.float32)     # (k*k, C) resident taps
    shift = t_ref[...].reshape(1, 1, C)    # folded (bias*scale + shift)

    def strip(si, carry):
        oh0 = si * hs                      # first output row of this strip
        ih0 = oh0 * stride                 # matching padded-input row
        acc = jnp.zeros((hs, Wfull, C), jnp.float32)
        for kh in range(k):
            blk = pad_ref[0, pl.ds(ih0 + kh, span), :, :].astype(jnp.float32)
            rows = blk if stride == 1 else blk[::stride]       # (hs, Wp, C)
            for kw in range(k):
                acc = acc + rows[:, kw:kw + Wfull, :] * w[kh * k + kw, :]
        if stride > 1:
            acc = acc[:, ::stride, :]      # single W subsample per strip
        h = jnp.maximum(acc + shift, 0.0)
        o_ref[0, pl.ds(oh0, hs), :, :] = h.astype(o_ref.dtype)
        return carry

    lax.fori_loop(0, Hout // hs, strip, 0)
    # TODO(synk): polyphase W deinterleave for stride-2 once VPU-bound.


# --------------------------------------------------------------------------
# Tiling helpers
# --------------------------------------------------------------------------
def _pick_pack_factor(n_rows, cin, cout):
    """Pixel-pack factor r (pixels per matmul row) so the output tile is
    >=128 lanes wide (ideally a multiple of 128).  r must divide n_rows."""
    if cout >= 128:
        return 1
    r_cap = min(max(1, 4096 // max(cin, cout)), n_rows, 128)
    divs = [r for r in range(1, r_cap + 1) if n_rows % r == 0]
    for r in divs:                       # smallest r giving a 128-multiple
        if (r * cout) % 128 == 0:
            return r
    for r in divs:                       # else smallest r reaching >=128 lanes
        if r * cout >= 128:
            return r
    return divs[-1]


def _row_tiling(n, tn_max):
    """Row tile TN <= tn_max; returns (TN, padded_n).  If no aligned divisor
    exists, pad the rows to a multiple of an 8-aligned tile (no whole-array
    fallback that could blow the scoped-VMEM limit)."""
    for t in (2048, 1024, 512, 256, 128, 64, 32, 16, 8):
        if t <= tn_max and n % t == 0:
            return t, n
    tn = min(tn_max, ((n + 7) // 8) * 8)
    padded = ((n + tn - 1) // tn) * tn
    return tn, padded


def _pick_channel_tile(c):
    """Lane dim of every depthwise block must be a multiple of 128 or full."""
    if c % 128 == 0 and c > 128:
        return 128
    return c
    # TODO(synk): pad awkward channel widths (144, 192, ...) to a 128-multiple
    # so very large C can still be tiled under v7x's 64 MiB VMEM.


def _pick_h_strip(hout, wp, c):
    """Strip height: bound per-strip f32 live values near the vreg file."""
    cap = max(1, min(8, (96 * 1024) // (wp * c * 4)))
    if hout <= cap:
        return hout
    for t in range(cap, 0, -1):
        if hout % t == 0:
            return t
    return 1


# --------------------------------------------------------------------------
# pallas_call wrappers
# --------------------------------------------------------------------------
def _pointwise_call(x2, w, shift, res=None, relu=False, out_dtype=jnp.float32,
                    tn_max=512, vmem_limit=32 * 1024 * 1024):
    """x2 (N, Cin) bf16, w (Cin, Cout) f32, shift (1, Cout) f32,
    optional res (N, Cout) bf16.  Returns (N, Cout) in out_dtype."""
    N, Cin = x2.shape
    Cout = w.shape[1]

    # ---- pixel packing: make the output lane axis >=128 wide ----
    r = _pick_pack_factor(N, Cin, Cout)
    if r > 1:
        w = jnp.kron(jnp.eye(r, dtype=w.dtype), w)     # block-diagonal weight
        shift = jnp.tile(shift, (1, r))
        x2 = x2.reshape(N // r, r * Cin)               # free row-major view
        if res is not None:
            res = res.reshape(N // r, r * Cout)
    Np, Ci = x2.shape
    Co = w.shape[1]

    w = w.astype(jnp.bfloat16)
    shift = shift.astype(jnp.float32)

    TN, Npad = _row_tiling(Np, tn_max)
    if Npad != Np:
        x2 = jnp.pad(x2, ((0, Npad - Np), (0, 0)))
        if res is not None:
            res = jnp.pad(res, ((0, Npad - Np), (0, 0)))

    add_res = res is not None
    kern = functools.partial(_pointwise_kernel, relu=relu, add_res=add_res)

    in_specs = [
        pl.BlockSpec((TN, Ci), lambda i: (i, 0)),      # activation tile
        pl.BlockSpec((Ci, Co), lambda i: (0, 0)),      # resident packed weight
        pl.BlockSpec((1, Co), lambda i: (0, 0)),       # resident fused shift
    ]
    ins = [x2, w, shift]
    if add_res:
        in_specs.append(pl.BlockSpec((TN, Co), lambda i: (i, 0)))
        ins.append(res)

    out = pl.pallas_call(
        kern,
        out_shape=jax.ShapeDtypeStruct((Npad, Co), out_dtype),
        grid=(Npad // TN,),
        in_specs=in_specs,
        out_specs=pl.BlockSpec((TN, Co), lambda i: (i, 0)),
        compiler_params=pltpu.CompilerParams(
            dimension_semantics=("parallel",),
            vmem_limit_bytes=vmem_limit),
    )(*ins)

    if Npad != Np:
        out = out[:Np]
    return out.reshape(N, Cout)


def _depthwise_call(x_nhwc, w2, shift2, *, k, stride, pad, Hout, Wout,
                    out_dtype=jnp.bfloat16, scratch_dtype=None,
                    vmem_limit=32 * 1024 * 1024):
    B, H, W, C = x_nhwc.shape
    TC = _pick_channel_tile(C)
    hs = _pick_h_strip(Hout, W + 2 * pad, TC)
    sd = scratch_dtype if scratch_dtype is not None else x_nhwc.dtype
    kern = functools.partial(_depthwise_kernel, k=k, stride=stride, pad=pad,
                             H=H, W=W, Hout=Hout, Wout=Wout, hs=hs)
    # TODO(synk): H-strip grid axis with a 2*pad halo for very large H*W.
    return pl.pallas_call(
        kern,
        out_shape=jax.ShapeDtypeStruct((B, Hout, Wout, C), out_dtype),
        grid=(B, C // TC),
        in_specs=[
            pl.BlockSpec((1, H, W, TC), lambda b, c: (b, 0, 0, c)),
            pl.BlockSpec((k * k, TC), lambda b, c: (0, c)),
            pl.BlockSpec((1, TC), lambda b, c: (0, c)),
        ],
        out_specs=pl.BlockSpec((1, Hout, Wout, TC), lambda b, c: (b, 0, 0, c)),
        scratch_shapes=[pltpu.VMEM((1, H + 2 * pad, W + 2 * pad, TC), sd)],
        compiler_params=pltpu.CompilerParams(
            dimension_semantics=("parallel", "parallel"),
            vmem_limit_bytes=vmem_limit),
    )(x_nhwc, w2, shift2)


# --------------------------------------------------------------------------
# Weight packing (bias + BN + channel shuffle folded into the weights)
# --------------------------------------------------------------------------
def _shuffle_perm(C, group):
    """ChannelShuffle permutation: shuffled[c'] = original[perm[c']]."""
    return np.arange(C).reshape(group, C // group).T.reshape(-1)


def grouped_pw_to_dense(w_oihw, group):
    """Grouped 1x1 conv weight (O, I/g, 1, 1) -> dense block-diagonal (Cin, O).

    Kept dense because ProxylessNAS groups are tiny (1-2).
    # TODO(synk): per-group grid axis for large group counts.
    """
    O, Ig = int(w_oihw.shape[0]), int(w_oihw.shape[1])
    Cin = Ig * group
    opg = O // group
    dense = jnp.zeros((Cin, O), jnp.float32)
    for g in range(group):
        blk = w_oihw[g * opg:(g + 1) * opg, :, 0, 0]          # (opg, Ig)
        dense = dense.at[g * Ig:(g + 1) * Ig, g * opg:(g + 1) * opg].set(blk.T)
    return dense


def proxyless_nas_block(x_nchw, params, *, C_in, C_out, kernel_size, stride,
                        expansion, group):
    pad = {1: 0, 3: 1, 5: 2, 7: 3}[kernel_size]
    B, _, H, W = x_nchw.shape
    Chid = C_in * expansion
    res_flag = (C_in == C_out) and (stride == 1)
    Hout = (H + 2 * pad - kernel_size) // stride + 1
    Wout = (W + 2 * pad - kernel_size) // stride + 1
    eps = 1e-5
    tn_max, vmem_limit, dw_scratch_dtype = _chip_budget()

    # ---- one-time packing: fold bias + eval-BN affine + shuffle into weights --
    perm_hid = _shuffle_perm(Chid, group)    # identity when group == 1
    perm_out = _shuffle_perm(C_out, group)

    s1 = params['bn1_gamma'] / jnp.sqrt(params['bn1_var'] + eps)
    t1 = params['bn1_beta'] - params['bn1_mean'] * s1
    s2 = params['bn2_gamma'] / jnp.sqrt(params['bn2_var'] + eps)
    t2 = params['bn2_beta'] - params['bn2_mean'] * s2

    w1 = grouped_pw_to_dense(params['w1'], group) * s1[None, :]
    sh1 = params['b1'] * s1 + t1
    w1 = w1[:, perm_hid]                                     # shuffled cols
    sh1 = sh1[perm_hid].reshape(1, Chid).astype(jnp.float32)

    w2 = jnp.transpose(params['w2'][:, 0, :, :], (1, 2, 0))  # (k, k, Chid)
    w2 = (w2.reshape(kernel_size * kernel_size, Chid) * s2[None, :]
          ).astype(jnp.float32)
    sh2 = (params['b2'] * s2 + t2).reshape(1, Chid).astype(jnp.float32)

    w3 = grouped_pw_to_dense(params['w3'], group)
    w3 = w3[:, perm_out]                                     # final shuffle folded
    sh3 = params['b3'][perm_out].reshape(1, C_out).astype(jnp.float32)

    # ---- layout: NCHW (PyTorch) -> NHWC, cast to bf16 BEFORE the transpose ----
    x_nhwc = jnp.transpose(x_nchw.astype(jnp.bfloat16), (0, 2, 3, 1))

    # stage 1: 1x1 expand conv (+BN+bias+ReLU fused, shuffle folded, pixel-packed)
    h1 = _pointwise_call(x_nhwc.reshape(B * H * W, C_in), w1, sh1,
                         relu=True, out_dtype=jnp.bfloat16,
                         tn_max=tn_max, vmem_limit=vmem_limit)
    h1 = h1.reshape(B, H, W, Chid)

    # stage 2: depthwise conv (+BN+bias+ReLU fused, padding built in VMEM)
    h2 = _depthwise_call(h1, w2, sh2, k=kernel_size, stride=stride, pad=pad,
                         Hout=Hout, Wout=Wout, out_dtype=jnp.bfloat16,
                         scratch_dtype=dw_scratch_dtype, vmem_limit=vmem_limit)

    # stage 3: 1x1 project conv (final shuffle folded; bf16 residual fused)
    res = x_nhwc.reshape(B * H * W, C_in) if res_flag else None
    out = _pointwise_call(h2.reshape(B * Hout * Wout, Chid), w3, sh3,
                          res=res, relu=False, out_dtype=jnp.float32,
                          tn_max=tn_max, vmem_limit=vmem_limit)
    out = out.reshape(B, Hout, Wout, C_out)
    return jnp.transpose(out, (0, 3, 1, 2))   # back to NCHW


# --------------------------------------------------------------------------
# Deterministic parameter init + numpy (float64) reference
# --------------------------------------------------------------------------
def _round_bf16(x):
    return x.astype(jnp.bfloat16).astype(jnp.float32)


def make_params(key, cfg):
    Cin, Cout = cfg['C_in'], cfg['C_out']
    k, group, exp = cfg['kernel_size'], cfg['group'], cfg['expansion']
    Chid = Cin * exp
    ks = jax.random.split(key, 6)

    def rnd(kk, shape, scale):
        return _round_bf16(jax.random.normal(kk, shape, jnp.float32) * scale)

    return dict(
        w1=rnd(ks[0], (Chid, Cin // group, 1, 1), 0.3),
        b1=rnd(ks[1], (Chid,), 0.1),
        w2=rnd(ks[2], (Chid, 1, k, k), 0.2),
        b2=rnd(ks[3], (Chid,), 0.1),
        w3=rnd(ks[4], (Cout, Chid // group, 1, 1), 0.3),
        b3=rnd(ks[5], (Cout,), 0.1),
        # BatchNorm2d (eval mode) parameters at PyTorch defaults
        bn1_gamma=jnp.ones((Chid,), jnp.float32),
        bn1_beta=jnp.zeros((Chid,), jnp.float32),
        bn1_mean=jnp.zeros((Chid,), jnp.float32),
        bn1_var=jnp.ones((Chid,), jnp.float32),
        bn2_gamma=jnp.ones((Chid,), jnp.float32),
        bn2_beta=jnp.zeros((Chid,), jnp.float32),
        bn2_mean=jnp.zeros((Chid,), jnp.float32),
        bn2_var=jnp.ones((Chid,), jnp.float32),
    )


def _np_conv2d(x, w, b, stride, pad, groups):
    B, C, H, W = x.shape
    O, Ig, kh, kw = w.shape
    Ho = (H + 2 * pad - kh) // stride + 1
    Wo = (W + 2 * pad - kw) // stride + 1
    xp = np.pad(x, ((0, 0), (0, 0), (pad, pad), (pad, pad)))
    out = np.zeros((B, O, Ho, Wo), dtype=np.float64)
    opg = O // groups
    for o in range(O):
        g = o // opg
        for i in range(Ig):
            cin = g * Ig + i
            for r in range(kh):
                for c in range(kw):
                    out[:, o] += w[o, i, r, c] * \
                        xp[:, cin, r:r + Ho * stride:stride,
                                   c:c + Wo * stride:stride]
        out[:, o] += b[o]
    return out


def _np_channel_shuffle(x, g):
    B, C, H, W = x.shape
    return x.reshape(B, g, C // g, H, W).transpose(0, 2, 1, 3, 4).reshape(B, C, H, W)


def np_reference(x, p, cfg):
    group, k, stride = cfg['group'], cfg['kernel_size'], cfg['stride']
    pad = {1: 0, 3: 1, 5: 2, 7: 3}[k]
    Chid = cfg['C_in'] * cfg['expansion']
    eps = 1e-5
    s1 = p['bn1_gamma'] / np.sqrt(p['bn1_var'] + eps)
    t1 = p['bn1_beta'] - p['bn1_mean'] * s1
    s2 = p['bn2_gamma'] / np.sqrt(p['bn2_var'] + eps)
    t2 = p['bn2_beta'] - p['bn2_mean'] * s2

    y = _np_conv2d(x, p['w1'], p['b1'], 1, 0, group)
    y = np.maximum(y * s1[None, :, None, None] + t1[None, :, None, None], 0.0)
    if group > 1:
        y = _np_channel_shuffle(y, group)
    y = _np_conv2d(y, p['w2'], p['b2'], stride, pad, Chid)
    y = np.maximum(y * s2[None, :, None, None] + t2[None, :, None, None], 0.0)
    y = _np_conv2d(y, p['w3'], p['b3'], 1, 0, group)
    if group > 1:
        y = _np_channel_shuffle(y, group)
    if cfg['C_in'] == cfg['C_out'] and stride == 1:
        y = y + x
    return y


# --------------------------------------------------------------------------
if __name__ == "__main__":
    configs = [
        # group == 1, residual active; pixel-packed pointwise (Cout 8/4 -> 128 lanes)
        dict(C_in=4, C_out=4, kernel_size=3, stride=1, expansion=2, group=1,
             batch=2, spatial=16),
        # group > 1: channel shuffles folded into the packed weights
        dict(C_in=4, C_out=8, kernel_size=5, stride=1, expansion=4, group=2,
             batch=4, spatial=16),
        # stride-2 depthwise, odd spatial (exercises the padded row-tile tail),
        # Chid=256 (exercises TC=128 channel tiling and r=1 / r=8 packing)
        dict(C_in=32, C_out=16, kernel_size=3, stride=2, expansion=8, group=1,
             batch=2, spatial=15),
    ]

    key = jax.random.PRNGKey(0)
    for cfg in configs:
        batch = cfg.pop('batch')
        spatial = cfg.pop('spatial')
        key, kx, kp = jax.random.split(key, 3)
        x = _round_bf16(jax.random.normal(
            kx, (batch, cfg['C_in'], spatial, spatial), jnp.float32))
        params = make_params(kp, cfg)

        fwd = jax.jit(functools.partial(proxyless_nas_block, **cfg))
        out = jax.block_until_ready(fwd(x, params))

        ref = np_reference(np.asarray(x, np.float64),
                           {k_: np.asarray(v, np.float64)
                            for k_, v in params.items()}, cfg)
        err = float(np.max(np.abs(np.asarray(out, np.float64) - ref)))
        # bf16 MXU operands + bf16 inter-stage activations; the scale-relative
        # term covers the wide (Chid=256) config where bf16 storage error
        # accumulates over the channel reduction.  Functional errors would be
        # O(max|ref|), far above this bound.
        tol = 5e-2 + 2e-2 * float(np.max(np.abs(ref)))
        if err > tol:
            raise AssertionError(
                f"Pallas/reference mismatch, max |err| = {err}, tol = {tol}")

    print("KERNEL_OK")
</pallas_src>

<mosaic_0001>
module attributes {stable_mosaic.version = 11 : i64} {
  func.func @_pointwise_kernel(%arg0: i32, %arg1: memref<32x64xbf16, #tpu.memory_space<vmem>>, %arg2: memref<64x128xbf16, #tpu.memory_space<vmem>>, %arg3: memref<1x128xf32, #tpu.memory_space<vmem>>, %arg4: memref<32x128xbf16, #tpu.memory_space<vmem>>) attributes {dimension_semantics = [#tpu.dimension_semantics<parallel>], iteration_bounds = array<i64: 1>, scalar_prefetch = 0 : i64, scratch_operands = 0 : i64, tpu.core_type = #tpu.core_type<tc>, window_params = [{transform_indices = @transform_0, window_bounds = array<i64: 32, 64>}, {pipeline_mode = #tpu.pipeline_mode<synchronous>, transform_indices = @transform_1, window_bounds = array<i64: 64, 128>}, {pipeline_mode = #tpu.pipeline_mode<synchronous>, transform_indices = @transform_2, window_bounds = array<i64: 1, 128>}, {transform_indices = @transform_3, window_bounds = array<i64: 32, 128>}]} {
    %c0 = arith.constant 0 : index
    %c0_0 = arith.constant 0 : index
    %0 = vector.load %arg1[%c0, %c0_0] : memref<32x64xbf16, #tpu.memory_space<vmem>>, vector<32x64xbf16>
    %c0_1 = arith.constant 0 : index
    %c0_2 = arith.constant 0 : index
    %1 = vector.load %arg2[%c0_1, %c0_2] : memref<64x128xbf16, #tpu.memory_space<vmem>>, vector<64x128xbf16>
    %cst = arith.constant dense<0.000000e+00> : vector<32x128xf32>
    %2 = tpu.matmul %0, %1, %cst {dimension_numbers = #tpu.dot_dimension_numbers<[1], [0], [0], [1], [0, 0, 1, 1], [], []>} : vector<32x64xbf16>, vector<64x128xbf16>, vector<32x128xf32> -> vector<32x128xf32>
    %c0_3 = arith.constant 0 : index
    %c0_4 = arith.constant 0 : index
    %3 = vector.load %arg3[%c0_3, %c0_4] : memref<1x128xf32, #tpu.memory_space<vmem>>, vector<1x128xf32>
    %4 = vector.broadcast %3 : vector<1x128xf32> to vector<32x128xf32>
    %5 = arith.addf %2, %4 : vector<32x128xf32>
    %cst_5 = arith.constant 0.000000e+00 : f32
    %6 = vector.broadcast %cst_5 : f32 to vector<32x128xf32>
    %7 = arith.maximumf %5, %6 : vector<32x128xf32>
    %8 = arith.truncf %7 : vector<32x128xf32> to vector<32x128xbf16>
    %c0_6 = arith.constant 0 : index
    %c0_7 = arith.constant 0 : index
    %9 = vector.load %arg4[%c0_6, %c0_7] : memref<32x128xbf16, #tpu.memory_space<vmem>>, vector<32x128xbf16>
    tpu.vector_store %arg4[%c0_6, %c0_7], %8 {strides = array<i32>} : memref<32x128xbf16, #tpu.memory_space<vmem>>, vector<32x128xbf16>,
    return
  }
  func.func @transform_0(%arg0: i32) -> (i32, i32) {
    %c0_i32 = arith.constant 0 : i32
    %c0_i32_0 = arith.constant 0 : i32
    return %arg0, %c0_i32 : i32, i32
  }
  func.func @transform_1(%arg0: i32) -> (i32, i32) {
    %c0_i32 = arith.constant 0 : i32
    %c0_i32_0 = arith.constant 0 : i32
    %c0_i32_1 = arith.constant 0 : i32
    return %c0_i32, %c0_i32_0 : i32, i32
  }
  func.func @transform_2(%arg0: i32) -> (i32, i32) {
    %c0_i32 = arith.constant 0 : i32
    %c0_i32_0 = arith.constant 0 : i32
    %c0_i32_1 = arith.constant 0 : i32
    return %c0_i32, %c0_i32_0 : i32, i32
  }
  func.func @transform_3(%arg0: i32) -> (i32, i32) {
    %c0_i32 = arith.constant 0 : i32
    %c0_i32_0 = arith.constant 0 : i32
    return %arg0, %c0_i32 : i32, i32
  }
}

module attributes {stable_mosaic.version = 11 : i64} {
  func.func @_depthwise_kernel(%arg0: i32, %arg1: i32, %arg2: memref<1x16x16x8xbf16, #tpu.memory_space<vmem>>, %arg3: memref<9x8xf32, #tpu.memory_space<vmem>>, %arg4: memref<1x8xf32, #tpu.memory_space<vmem>>, %arg5: memref<1x16x16x8xbf16, #tpu.memory_space<vmem>>, %arg6: memref<1x18x18x8xbf16, #tpu.memory_space<vmem>>) attributes {dimension_semantics = [#tpu.dimension_semantics<parallel>, #tpu.dimension_semantics<parallel>], iteration_bounds = array<i64: 2, 1>, scalar_prefetch = 0 : i64, scratch_operands = 1 : i64, tpu.core_type = #tpu.core_type<tc>, window_params = [{transform_indices = @transform_0, window_bounds = array<i64: 1, 16, 16, 8>}, {transform_indices = @transform_1, window_bounds = array<i64: 9, 8>}, {transform_indices = @transform_2, window_bounds = array<i64: 1, 8>}, {transform_indices = @transform_3, window_bounds = array<i64: 1, 16, 16, 8>}]} {
    %cst = arith.constant 0.000000e+00 : bf16
    %0 = vector.broadcast %cst : bf16 to vector<1x1x18x8xbf16>
    %c0 = arith.constant 0 : index
    %c0_0 = arith.constant 0 : index
    %c0_1 = arith.constant 0 : index
    %c0_2 = arith.constant 0 : index
    %1 = vector.load %arg6[%c0, %c0_0, %c0_1, %c0_2] : memref<1x18x18x8xbf16, #tpu.memory_space<vmem>>, vector<1x1x18x8xbf16>
    tpu.vector_store %arg6[%c0, %c0_0, %c0_1, %c0_2], %0 {strides = array<i32>} : memref<1x18x18x8xbf16, #tpu.memory_space<vmem>>, vector<1x1x18x8xbf16>,
    %c0_3 = arith.constant 0 : index
    %c17 = arith.constant 17 : index
    %c0_4 = arith.constant 0 : index
    %c0_5 = arith.constant 0 : index
    %2 = vector.load %arg6[%c0_3, %c17, %c0_4, %c0_5] : memref<1x18x18x8xbf16, #tpu.memory_space<vmem>>, vector<1x1x18x8xbf16>
    tpu.vector_store %arg6[%c0_3, %c17, %c0_4, %c0_5], %0 {strides = array<i32>} : memref<1x18x18x8xbf16, #tpu.memory_space<vmem>>, vector<1x1x18x8xbf16>,
    %cst_6 = arith.constant 0.000000e+00 : bf16
    %3 = vector.broadcast %cst_6 : bf16 to vector<1x16x1x8xbf16>
    %c0_7 = arith.constant 0 : index
    %c1 = arith.constant 1 : index
    %c0_8 = arith.constant 0 : index
    %c0_9 = arith.constant 0 : index
    %4 = vector.load %arg6[%c0_7, %c1, %c0_8, %c0_9] : memref<1x18x18x8xbf16, #tpu.memory_space<vmem>>, vector<1x16x1x8xbf16>
    tpu.vector_store %arg6[%c0_7, %c1, %c0_8, %c0_9], %3 {strides = array<i32>} : memref<1x18x18x8xbf16, #tpu.memory_space<vmem>>, vector<1x16x1x8xbf16>,
    %c0_10 = arith.constant 0 : index
    %c1_11 = arith.constant 1 : index
    %c17_12 = arith.constant 17 : index
    %c0_13 = arith.constant 0 : index
    %5 = vector.load %arg6[%c0_10, %c1_11, %c17_12, %c0_13] : memref<1x18x18x8xbf16, #tpu.memory_space<vmem>>, vector<1x16x1x8xbf16>
    tpu.vector_store %arg6[%c0_10, %c1_11, %c17_12, %c0_13], %3 {strides = array<i32>} : memref<1x18x18x8xbf16, #tpu.memory_space<vmem>>, vector<1x16x1x8xbf16>,
    %c0_14 = arith.constant 0 : index
    %c0_15 = arith.constant 0 : index
    %c0_16 = arith.constant 0 : index
    %c0_17 = arith.constant 0 : index
    %6 = vector.load %arg2[%c0_14, %c0_15, %c0_16, %c0_17] : memref<1x16x16x8xbf16, #tpu.memory_space<vmem>>, vector<1x16x16x8xbf16>
    %c0_18 = arith.constant 0 : index
    %c1_19 = arith.constant 1 : index
    %c1_20 = arith.constant 1 : index
    %c0_21 = arith.constant 0 : index
    %7 = vector.load %arg6[%c0_18, %c1_19, %c1_20, %c0_21] : memref<1x18x18x8xbf16, #tpu.memory_space<vmem>>, vector<1x16x16x8xbf16>
    tpu.vector_store %arg6[%c0_18, %c1_19, %c1_20, %c0_21], %6 {strides = array<i32>} : memref<1x18x18x8xbf16, #tpu.memory_space<vmem>>, vector<1x16x16x8xbf16>,
    %c0_22 = arith.constant 0 : index
    %c0_23 = arith.constant 0 : index
    %8 = vector.load %arg3[%c0_22, %c0_23] : memref<9x8xf32, #tpu.memory_space<vmem>>, vector<9x8xf32>
    %c0_24 = arith.constant 0 : index
    %c0_25 = arith.constant 0 : index
    %9 = vector.load %arg4[%c0_24, %c0_25] : memref<1x8xf32, #tpu.memory_space<vmem>>, vector<1x8xf32>
    %10 = vector.shape_cast %9 : vector<1x8xf32> to vector<1x1x8xf32>
    %c0_i32 = arith.constant 0 : i32
    %c2_i32 = arith.constant 2 : i32
    %11 = arith.addi %c0_i32, %c2_i32 : i32
    %c1_i32 = arith.constant 1 : i32
    scf.for %arg7 = %c0_i32 to %11 step %c1_i32  : i32 {
      %c8_i32 = arith.constant 8 : i32
      %12 = arith.muli %arg7, %c8_i32 : i32
      %c1_i32_27 = arith.constant 1 : i32
      %13 = arith.muli %12, %c1_i32_27 : i32
      %cst_28 = arith.constant 0.000000e+00 : f32
      %14 = vector.broadcast %cst_28 : f32 to vector<8x16x8xf32>
      %c0_i32_29 = arith.constant 0 : i32
      %15 = arith.addi %13, %c0_i32_29 : i32
      %c0_30 = arith.constant 0 : index
      %16 = arith.index_cast %15 : i32 to index
      %c0_31 = arith.constant 0 : index
      %c0_32 = arith.constant 0 : index
      %17 = vector.load %arg6[%c0_30, %16, %c0_31, %c0_32] : memref<1x18x18x8xbf16, #tpu.memory_space<vmem>>, vector<1x8x18x8xbf16>
      %18 = vector.shape_cast %17 : vector<1x8x18x8xbf16> to vector<8x18x8xbf16>
      %19 = arith.extf %18 : vector<8x18x8xbf16> to vector<8x18x8xf32>
      %20 = vector.extract_strided_slice %19 {offsets = [0, 0, 0], sizes = [8, 16, 8], strides = [1, 1, 1]} : vector<8x18x8xf32> to vector<8x16x8xf32>
      %21 = vector.extract_strided_slice %8 {offsets = [0, 0], sizes = [1, 8], strides = [1, 1]} : vector<9x8xf32> to vector<1x8xf32>
      %22 = vector.shape_cast %21 : vector<1x8xf32> to vector<8xf32>
      %23 = vector.shape_cast %22 : vector<8xf32> to vector<1x1x8xf32>
      %24 = vector.broadcast %23 : vector<1x1x8xf32> to vector<8x16x8xf32>
      %25 = arith.mulf %20, %24 : vector<8x16x8xf32>
      %26 = arith.addf %14, %25 : vector<8x16x8xf32>
      %27 = vector.extract_strided_slice %19 {offsets = [0, 1, 0], sizes = [8, 16, 8], strides = [1, 1, 1]} : vector<8x18x8xf32> to vector<8x16x8xf32>
      %28 = vector.extract_strided_slice %8 {offsets = [1, 0], sizes = [1, 8], strides = [1, 1]} : vector<9x8xf32> to vector<1x8xf32>
      %29 = vector.shape_cast %28 : vector<1x8xf32> to vector<8xf32>
      %30 = vector.shape_cast %29 : vector<8xf32> to vector<1x1x8xf32>
      %31 = vector.broadcast %30 : vector<1x1x8xf32> to vector<8x16x8xf32>
      %32 = arith.mulf %27, %31 : vector<8x16x8xf32>
      %33 = arith.addf %26, %32 : vector<8x16x8xf32>
      %34 = vector.extract_strided_slice %19 {offsets = [0, 2, 0], sizes = [8, 16, 8], strides = [1, 1, 1]} : vector<8x18x8xf32> to vector<8x16x8xf32>
      %35 = vector.extract_strided_slice %8 {offsets = [2, 0], sizes = [1, 8], strides = [1, 1]} : vector<9x8xf32> to vector<1x8xf32>
      %36 = vector.shape_cast %35 : vector<1x8xf32> to vector<8xf32>
      %37 = vector.shape_cast %36 : vector<8xf32> to vector<1x1x8xf32>
      %38 = vector.broadcast %37 : vector<1x1x8xf32> to vector<8x16x8xf32>
      %39 = arith.mulf %34, %38 : vector<8x16x8xf32>
      %40 = arith.addf %33, %39 : vector<8x16x8xf32>
      %c1_i32_33 = arith.constant 1 : i32
      %41 = arith.addi %13, %c1_i32_33 : i32
      %c0_34 = arith.constant 0 : index
      %42 = arith.index_cast %41 : i32 to index
      %c0_35 = arith.constant 0 : index
      %c0_36 = arith.constant 0 : index
      %43 = vector.load %arg6[%c0_34, %42, %c0_35, %c0_36] : memref<1x18x18x8xbf16, #tpu.memory_space<vmem>>, vector<1x8x18x8xbf16>
      %44 = vector.shape_cast %43 : vector<1x8x18x8xbf16> to vector<8x18x8xbf16>
      %45 = arith.extf %44 : vector<8x18x8xbf16> to vector<8x18x8xf32>
      %46 = vector.extract_strided_slice %45 {offsets = [0, 0, 0], sizes = [8, 16, 8], strides = [1, 1, 1]} : vector<8x18x8xf32> to vector<8x16x8xf32>
      %47 = vector.extract_strided_slice %8 {offsets = [3, 0], sizes = [1, 8], strides = [1, 1]} : vector<9x8xf32> to vector<1x8xf32>
      %48 = vector.shape_cast %47 : vector<1x8xf32> to vector<8xf32>
      %49 = vector.shape_cast %48 : vector<8xf32> to vector<1x1x8xf32>
      %50 = vector.broadcast %49 : vector<1x1x8xf32> to vector<8x16x8xf32>
      %51 = arith.mulf %46, %50 : vector<8x16x8xf32>
      %52 = arith.addf %40, %51 : vector<8x16x8xf32>
      %53 = vector.extract_strided_slice %45 {offsets = [0, 1, 0], sizes = [8, 16, 8], strides = [1, 1, 1]} : vector<8x18x8xf32> to vector<8x16x8xf32>
      %54 = vector.extract_strided_slice %8 {offsets = [4, 0], sizes = [1, 8], strides = [1, 1]} : vector<9x8xf32> to vector<1x8xf32>
      %55 = vector.shape_cast %54 : vector<1x8xf32> to vector<8xf32>
      %56 = vector.shape_cast %55 : vector<8xf32> to vector<1x1x8xf32>
      %57 = vector.broadcast %56 : vector<1x1x8xf32> to vector<8x16x8xf32>
      %58 = arith.mulf %53, %57 : vector<8x16x8xf32>
      %59 = arith.addf %52, %58 : vector<8x16x8xf32>
      %60 = vector.extract_strided_slice %45 {offsets = [0, 2, 0], sizes = [8, 16, 8], strides = [1, 1, 1]} : vector<8x18x8xf32> to vector<8x16x8xf32>
      %61 = vector.extract_strided_slice %8 {offsets = [5, 0], sizes = [1, 8], strides = [1, 1]} : vector<9x8xf32> to vector<1x8xf32>
      %62 = vector.shape_cast %61 : vector<1x8xf32> to vector<8xf32>
      %63 = vector.shape_cast %62 : vector<8xf32> to vector<1x1x8xf32>
      %64 = vector.broadcast %63 : vector<1x1x8xf32> to vector<8x16x8xf32>
      %65 = arith.mulf %60, %64 : vector<8x16x8xf32>
      %66 = arith.addf %59, %65 : vector<8x16x8xf32>
      %c2_i32_37 = arith.constant 2 : i32
      %67 = arith.addi %13, %c2_i32_37 : i32
      %c0_38 = arith.constant 0 : index
      %68 = arith.index_cast %67 : i32 to index
      %c0_39 = arith.constant 0 : index
      %c0_40 = arith.constant 0 : index
      %69 = vector.load %arg6[%c0_38, %68, %c0_39, %c0_40] : memref<1x18x18x8xbf16, #tpu.memory_space<vmem>>, vector<1x8x18x8xbf16>
      %70 = vector.shape_cast %69 : vector<1x8x18x8xbf16> to vector<8x18x8xbf16>
      %71 = arith.extf %70 : vector<8x18x8xbf16> to vector<8x18x8xf32>
      %72 = vector.extract_strided_slice %71 {offsets = [0, 0, 0], sizes = [8, 16, 8], strides = [1, 1, 1]} : vector<8x18x8xf32> to vector<8x16x8xf32>
      %73 = vector.extract_strided_slice %8 {offsets = [6, 0], sizes = [1, 8], strides = [1, 1]} : vector<9x8xf32> to vector<1x8xf32>
      %74 = vector.shape_cast %73 : vector<1x8xf32> to vector<8xf32>
      %75 = vector.shape_cast %74 : vector<8xf32> to vector<1x1x8xf32>
      %76 = vector.broadcast %75 : vector<1x1x8xf32> to vector<8x16x8xf32>
      %77 = arith.mulf %72, %76 : vector<8x16x8xf32>
      %78 = arith.addf %66, %77 : vector<8x16x8xf32>
      %79 = vector.extract_strided_slice %71 {offsets = [0, 1, 0], sizes = [8, 16, 8], strides = [1, 1, 1]} : vector<8x18x8xf32> to vector<8x16x8xf32>
      %80 = vector.extract_strided_slice %8 {offsets = [7, 0], sizes = [1, 8], strides = [1, 1]} : vector<9x8xf32> to vector<1x8xf32>
      %81 = vector.shape_cast %80 : vector<1x8xf32> to vector<8xf32>
      %82 = vector.shape_cast %81 : vector<8xf32> to vector<1x1x8xf32>
      %83 = vector.broadcast %82 : vector<1x1x8xf32> to vector<8x16x8xf32>
      %84 = arith.mulf %79, %83 : vector<8x16x8xf32>
      %85 = arith.addf %78, %84 : vector<8x16x8xf32>
      %86 = vector.extract_strided_slice %71 {offsets = [0, 2, 0], sizes = [8, 16, 8], strides = [1, 1, 1]} : vector<8x18x8xf32> to vector<8x16x8xf32>
      %87 = vector.extract_strided_slice %8 {offsets = [8, 0], sizes = [1, 8], strides = [1, 1]} : vector<9x8xf32> to vector<1x8xf32>
      %88 = vector.shape_cast %87 : vector<1x8xf32> to vector<8xf32>
      %89 = vector.shape_cast %88 : vector<8xf32> to vector<1x1x8xf32>
      %90 = vector.broadcast %89 : vector<1x1x8xf32> to vector<8x16x8xf32>
      %91 = arith.mulf %86, %90 : vector<8x16x8xf32>
      %92 = arith.addf %85, %91 : vector<8x16x8xf32>
      %93 = vector.broadcast %10 : vector<1x1x8xf32> to vector<8x16x8xf32>
      %94 = arith.addf %92, %93 : vector<8x16x8xf32>
      %cst_41 = arith.constant 0.000000e+00 : f32
      %95 = vector.broadcast %cst_41 : f32 to vector<8x16x8xf32>
      %96 = arith.maximumf %94, %95 : vector<8x16x8xf32>
      %97 = arith.truncf %96 : vector<8x16x8xf32> to vector<8x16x8xbf16>
      %c0_42 = arith.constant 0 : index
      %98 = arith.index_cast %12 : i32 to index
      %c0_43 = arith.constant 0 : index
      %c0_44 = arith.constant 0 : index
      %99 = vector.load %arg5[%c0_42, %98, %c0_43, %c0_44] : memref<1x16x16x8xbf16, #tpu.memory_space<vmem>>, vector<1x8x16x8xbf16>
      %100 = vector.shape_cast %99 : vector<1x8x16x8xbf16> to vector<8x16x8xbf16>
      %101 = vector.shape_cast %97 : vector<8x16x8xbf16> to vector<1x8x16x8xbf16>
      tpu.vector_store %arg5[%c0_42, %98, %c0_43, %c0_44], %101 {strides = array<i32>} : memref<1x16x16x8xbf16, #tpu.memory_space<vmem>>, vector<1x8x16x8xbf16>,
    }
    %c2_i32_26 = arith.constant 2 : i32
    return
  }
  func.func @transform_0(%arg0: i32, %arg1: i32) -> (i32, i32, i32, i32) {
    %c0_i32 = arith.constant 0 : i32
    %c0_i32_0 = arith.constant 0 : i32
    %c0_i32_1 = arith.constant 0 : i32
    return %arg0, %c0_i32, %c0_i32_0, %arg1 : i32, i32, i32, i32
  }
  func.func @transform_1(%arg0: i32, %arg1: i32) -> (i32, i32) {
    %c0_i32 = arith.constant 0 : i32
    %c0_i32_0 = arith.constant 0 : i32
    return %c0_i32, %arg1 : i32, i32
  }
  func.func @transform_2(%arg0: i32, %arg1: i32) -> (i32, i32) {
    %c0_i32 = arith.constant 0 : i32
    %c0_i32_0 = arith.constant 0 : i32
    return %c0_i32, %arg1 : i32, i32
  }
  func.func @transform_3(%arg0: i32, %arg1: i32) -> (i32, i32, i32, i32) {
    %c0_i32 = arith.constant 0 : i32
    %c0_i32_0 = arith.constant 0 : i32
    %c0_i32_1 = arith.constant 0 : i32
    return %arg0, %c0_i32, %c0_i32_0, %arg1 : i32, i32, i32, i32
  }
}

module attributes {stable_mosaic.version = 11 : i64} {
  func.func @_pointwise_kernel(%arg0: i32, %arg1: memref<16x256xbf16, #tpu.memory_space<vmem>>, %arg2: memref<256x128xbf16, #tpu.memory_space<vmem>>, %arg3: memref<1x128xf32, #tpu.memory_space<vmem>>, %arg4: memref<16x128xbf16, #tpu.memory_space<vmem>>, %arg5: memref<16x128xf32, #tpu.memory_space<vmem>>) attributes {dimension_semantics = [#tpu.dimension_semantics<parallel>], iteration_bounds = array<i64: 1>, scalar_prefetch = 0 : i64, scratch_operands = 0 : i64, tpu.core_type = #tpu.core_type<tc>, window_params = [{transform_indices = @transform_0, window_bounds = array<i64: 16, 256>}, {pipeline_mode = #tpu.pipeline_mode<synchronous>, transform_indices = @transform_1, window_bounds = array<i64: 256, 128>}, {pipeline_mode = #tpu.pipeline_mode<synchronous>, transform_indices = @transform_2, window_bounds = array<i64: 1, 128>}, {transform_indices = @transform_3, window_bounds = array<i64: 16, 128>}, {transform_indices = @transform_4, window_bounds = array<i64: 16, 128>}]} {
    %c0 = arith.constant 0 : index
    %c0_0 = arith.constant 0 : index
    %0 = vector.load %arg1[%c0, %c0_0] : memref<16x256xbf16, #tpu.memory_space<vmem>>, vector<16x256xbf16>
    %c0_1 = arith.constant 0 : index
    %c0_2 = arith.constant 0 : index
    %1 = vector.load %arg2[%c0_1, %c0_2] : memref<256x128xbf16, #tpu.memory_space<vmem>>, vector<256x128xbf16>
    %cst = arith.constant dense<0.000000e+00> : vector<16x128xf32>
    %2 = tpu.matmul %0, %1, %cst {dimension_numbers = #tpu.dot_dimension_numbers<[1], [0], [0], [1], [0, 0, 1, 1], [], []>} : vector<16x256xbf16>, vector<256x128xbf16>, vector<16x128xf32> -> vector<16x128xf32>
    %c0_3 = arith.constant 0 : index
    %c0_4 = arith.constant 0 : index
    %3 = vector.load %arg3[%c0_3, %c0_4] : memref<1x128xf32, #tpu.memory_space<vmem>>, vector<1x128xf32>
    %4 = vector.broadcast %3 : vector<1x128xf32> to vector<16x128xf32>
    %5 = arith.addf %2, %4 : vector<16x128xf32>
    %c0_5 = arith.constant 0 : index
    %c0_6 = arith.constant 0 : index
    %6 = vector.load %arg4[%c0_5, %c0_6] : memref<16x128xbf16, #tpu.memory_space<vmem>>, vector<16x128xbf16>
    %7 = arith.extf %6 : vector<16x128xbf16> to vector<16x128xf32>
    %8 = arith.addf %5, %7 : vector<16x128xf32>
    %c0_7 = arith.constant 0 : index
    %c0_8 = arith.constant 0 : index
    %9 = vector.load %arg5[%c0_7, %c0_8] : memref<16x128xf32, #tpu.memory_space<vmem>>, vector<16x128xf32>
    tpu.vector_store %arg5[%c0_7, %c0_8], %8 {strides = array<i32>} : memref<16x128xf32, #tpu.memory_space<vmem>>, vector<16x128xf32>,
    return
  }
  func.func @transform_0(%arg0: i32) -> (i32, i32) {
    %c0_i32 = arith.constant 0 : i32
    %c0_i32_0 = arith.constant 0 : i32
    return %arg0, %c0_i32 : i32, i32
  }
  func.func @transform_1(%arg0: i32) -> (i32, i32) {
    %c0_i32 = arith.constant 0 : i32
    %c0_i32_0 = arith.constant 0 : i32
    %c0_i32_1 = arith.constant 0 : i32
    return %c0_i32, %c0_i32_0 : i32, i32
  }
  func.func @transform_2(%arg0: i32) -> (i32, i32) {
    %c0_i32 = arith.constant 0 : i32
    %c0_i32_0 = arith.constant 0 : i32
    %c0_i32_1 = arith.constant 0 : i32
    return %c0_i32, %c0_i32_0 : i32, i32
  }
  func.func @transform_3(%arg0: i32) -> (i32, i32) {
    %c0_i32 = arith.constant 0 : i32
    %c0_i32_0 = arith.constant 0 : i32
    return %arg0, %c0_i32 : i32, i32
  }
  func.func @transform_4(%arg0: i32) -> (i32, i32) {
    %c0_i32 = arith.constant 0 : i32
    %c0_i32_0 = arith.constant 0 : i32
    return %arg0, %c0_i32 : i32, i32
  }
}

</mosaic_0001>

<bundles_post_ra>
// kernel: proxyless_nas_block.3
= control target key start
LH: loop header
LB: loop body
LE: loop exit
PB: predicated region body
PF: predicated region fallthrough
CT: control target
= control target key end

     0   :  { %vm68_vm0 = vcmask 523264   ;;  %s251_s1 = inlined_call_operand.vmem [shape: bf16[64,128], index: 1, kind: input, shape index: {}]   ;;  %s252_s0 = inlined_call_operand.vmem [shape: bf16[32,64], index: 0, kind: input, shape index: {}]   ;;  %s253_s2 = inlined_call_operand.vmem [shape: f32[1,128], index: 2, kind: input, shape index: {}]   ;;  %s254_s3 = inlined_call_operand.vmem [shape: bf16[32,128], index: 3, kind: output, shape index: {}]  }
   0x1   :  { %v198_v0 = vld [vmem:[%s251_s1 + $0x18] sm:$0xff]   ;;  %v199_v1 = vld [vmem:[%s251_s1 + $0x10] sm:$0xff]   ;;  %v200_v2 = vld [vmem:[%s251_s1 + $0x8] sm:$0xff]  }
   0x2   :  { %186 = vmatprep.subr.bf16.mxu0 %v198_v0  ;;  %v202_v3 = vld [vmem:[%s252_s0] sm:$0xff]   ;;  %v203_v5 = vld [vmem:[%s252_s0 + $0x8] sm:$0xff]  }
   0x3   :  { %187 = vmatpush3.bf16.msra.mxu0 %v198_v0  ;;  %194 = vmatprep.mubr.msk.bf16.mxu0 %vm68_vm0, %v202_v3  ;;  %v201_v4 = vld [vmem:[%s251_s1] sm:$0xff]  }
   0x4   :  { %188 = vmatprep.subr.bf16.mxu0 %v199_v1  ;;  %v152_v7 = vld [vmem:[%s253_s2] ss:$0 sm:$0xff] }
   0x7   :  { %189 = vmatpush3.bf16.msra.mxu0 %v199_v1 }
   0x8   :  { %190 = vmatprep.subr.bf16.mxu0 %v200_v2 }
   0xb   :  { %191 = vmatpush3.bf16.msra.mxu0 %v200_v2 }
   0xc   :  { %192 = vmatprep.subr.bf16.mxu0 %v201_v4 }
   0xf   :  { %193 = vmatpush3.bf16.msra.mxu0 %v201_v4 }
  0x12   :  { %195 = vmatmul.mubr.msk.bf16.vlgmr.msra.gmra.mxu0 %vm68_vm0, %v203_v5 }
  0xd2   :  { %v196_v6 = vpop.f32.mrf.mxu0 }
  0xd3   :  { %v118_v9 = vadd.f32 %v196_v6, %v152_v7 }
  0xd4   :  { %v109_v8 = vpop.f32.mrf.mxu0 }
  0xd5   :  { %v110_v11 = vadd.f32 %v152_v7, %v109_v8  ;;  %v126_v14 = vmax.f32 %v118_v9, 0.0 }
  0xd6   :  { %v197_v10 = vpop.f32.mrf.mxu0 }
  0xd7   :  { %v121_v12 = vadd.f32 %v197_v10, %v152_v7  ;;  %v124_v17 = vmax.f32 %v110_v11, 0.0 }
  0xd8   :  { %v112_v13 = vpop.f32.mrf.mxu0 }
  0xd9   :  { %v127_v15 = vmax.f32 %v121_v12, 0.0  ;;  %v113_v16 = vadd.f32 %v152_v7, %v112_v13 }
  0xdb   :  { %v177_v18 = vpack.c.bf16 %v127_v15, %v126_v14  ;;  %v125_v19 = vmax.f32 %v113_v16, 0.0 }
  0xdd   :  { %179 = vst [vmem:[%s254_s3 + $0x8] sm:$0xff] %v177_v18   ;;  %v172_v20 = vpack.c.bf16 %v125_v19, %v124_v17 }
  0xdf   :  { %173 = vst [vmem:[%s254_s3] sm:$0xff] %v172_v20  }

// kernel: proxyless_nas_block.5
= control target key start
LH: loop header
LB: loop body
LE: loop exit
PB: predicated region body
PF: predicated region fallthrough
CT: control target
= control target key end

     0   :  { %s373_s1 = inlined_call_operand.vmem [shape: bf16[256,128], index: 1, kind: input, shape index: {}]   ;;  %s374_s0 = inlined_call_operand.vmem [shape: bf16[16,256], index: 0, kind: input, shape index: {}]   ;;  %s375_s3 = inlined_call_operand.vmem [shape: bf16[16,128], index: 3, kind: input, shape index: {}]   ;;  %s376_s2 = inlined_call_operand.vmem [shape: f32[1,128], index: 2, kind: input, shape index: {}]   ;;  %s377_s4 = inlined_call_operand.vmem [shape: f32[16,128], index: 4, kind: output, shape index: {}]  }
   0x1   :  { %v263_v0 = vld [vmem:[%s373_s1 + $0x78] sm:$0xff]   ;;  %v265_v2 = vld [vmem:[%s373_s1 + $0x70] sm:$0xff]   ;;  %v267_v4 = vld [vmem:[%s373_s1 + $0x68] sm:$0xff]  }
   0x2   :  { %v264_v1 = vld [vmem:[%s373_s1 + $0x38] sm:$0xff]   ;;  %241 = vmatprep.subr.bf16.mxu0 %v263_v0  ;;  %v266_v3 = vld [vmem:[%s373_s1 + $0x30] sm:$0xff]   ;;  %v268_v5 = vld [vmem:[%s373_s1 + $0x28] sm:$0xff]  }
   0x3   :  { %242 = vmatpush3.bf16.msra.mxu0 %v264_v1  ;;  %v269_v6 = vld [vmem:[%s373_s1 + $0x60] sm:$0xff]   ;;  %v271_v8 = vld [vmem:[%s373_s1 + $0x58] sm:$0xff]   ;;  %v273_v10 = vld [vmem:[%s373_s1 + $0x50] sm:$0xff]  }
   0x4   :  { %243 = vmatprep.subr.bf16.mxu0 %v265_v2  ;;  %v270_v7 = vld [vmem:[%s373_s1 + $0x20] sm:$0xff]   ;;  %v272_v9 = vld [vmem:[%s373_s1 + $0x18] sm:$0xff]   ;;  %v274_v12 = vld [vmem:[%s373_s1 + $0x10] sm:$0xff]  }
   0x5   :  { %v281_v11 = vld [vmem:[%s374_s0 + $0x4] ss:$8 sps:$4 sm:$0xff]   ;;  %v279_v17 = vld [vmem:[%s374_s0] ss:$8 sps:$4 sm:$0xff]  }
   0x6   :  { %197 = vmatprep.mubr.bf16.mxu0 %v281_v11  ;;  %v275_v13 = vld [vmem:[%s373_s1 + $0x48] sm:$0xff]   ;;  %v277_v15 = vld [vmem:[%s373_s1 + $0x40] sm:$0xff]  }
   0x7   :  { %244 = vmatpush3.bf16.msra.mxu0 %v266_v3  ;;  %v276_v14 = vld [vmem:[%s373_s1 + $0x8] sm:$0xff]   ;;  %v278_v16 = vld [vmem:[%s373_s1] sm:$0xff]  }
   0x8   :  { %245 = vmatprep.subr.bf16.mxu0 %v267_v4  ;;  %v238_v19 = vld [vmem:[%s375_s3] sm:$0xff]  }
   0x9   :  { %v218_v20 = vld [vmem:[%s376_s2] ss:$0 sm:$0xff]  ;;  %v239_v23 = vunpack.c.l.bf16 %v238_v19  ;;  %v240_v29 = vunpack.c.h.bf16 %v238_v19 }
   0xb   :  { %246 = vmatpush3.bf16.msra.mxu0 %v268_v5 }
   0xc   :  { %247 = vmatprep.subr.bf16.mxu0 %v269_v6 }
   0xf   :  { %248 = vmatpush3.bf16.msra.mxu0 %v270_v7 }
  0x10   :  { %249 = vmatprep.subr.bf16.mxu0 %v271_v8 }
  0x13   :  { %250 = vmatpush3.bf16.msra.mxu0 %v272_v9 }
  0x14   :  { %251 = vmatprep.subr.bf16.mxu0 %v273_v10 }
  0x17   :  { %252 = vmatpush3.bf16.msra.mxu0 %v274_v12 }
  0x18   :  { %253 = vmatprep.subr.bf16.mxu0 %v275_v13 }
  0x1b   :  { %254 = vmatpush3.bf16.msra.mxu0 %v276_v14 }
  0x1c   :  { %255 = vmatprep.subr.bf16.mxu0 %v277_v15 }
  0x1f   :  { %256 = vmatpush3.bf16.msra.mxu0 %v278_v16 }
  0x22   :  { %198 = vmatmul.mubr.bf16.vlgmr.msra.gmra.mxu0 %v279_v17 }
  0xe2   :  { %v257_v18 = vpop.f32.mrf.mxu0 }
  0xe4   :  { %v258_v21 = vpop.f32.mrf.mxu0 }
  0xe5   :  { %v259_v22 = vadd.f32 %v258_v21, %v257_v18 }
  0xe6   :  { %v260_v24 = vpop.f32.mrf.mxu0 }
  0xe7   :  { %v200_v25 = vadd.f32 %v259_v22, %v218_v20 }
  0xe8   :  { %v261_v26 = vpop.f32.mrf.mxu0 }
  0xe9   :  { %v210_v27 = vadd.f32 %v239_v23, %v200_v25  ;;  %v262_v28 = vadd.f32 %v261_v26, %v260_v24 }
  0xeb   :  { %212 = vst [vmem:[%s377_s4] sm:$0xff] %v210_v27  ;;  %v203_v30 = vadd.f32 %v262_v28, %v218_v20 }
  0xed   :  { %v211_v31 = vadd.f32 %v240_v29, %v203_v30 }
  0xef   :  { %213 = vst [vmem:[%s377_s4 + $0x8] sm:$0xff] %v211_v31 }

// kernel: proxyless_nas_block.4
= control target key start
LH: loop header
LB: loop body
LE: loop exit
PB: predicated region body
PF: predicated region fallthrough
CT: control target
= control target key end

     0   :  { %s2335_s12 = smov 0   ;;  %s2337_s13 = smov 0   ;;  %s3190_s0 = inlined_call_operand.vmem [shape: bf16[2,16,16,8], index: 0, kind: input, shape index: {}]   ;;  %s3191_s1 = inlined_call_operand.vmem [shape: f32[9,8], index: 1, kind: input, shape index: {}]   ;;  %s3192_s2 = inlined_call_operand.vmem [shape: f32[1,8], index: 2, kind: input, shape index: {}]   ;;  %s3193_s3 = inlined_call_operand.vmem [shape: bf16[2,16,16,8], index: 3, kind: output, shape index: {}]  }
   0x1   :  { %s2339_s14 = smov 0  }
   0x2 LB: > { %s25_s15 = sadd.s32 1, %s2304_s13  ;;  %p2087_p0 = scmp.ge.s32.totalorder %s2308_s14, 1  ;;  %s2308_s14 = sphi %s2339_s14, %s13_s14   ;;  %s2304_s13 = sphi %s2337_s13, %s3203_s13   ;;  %s2300_s12 = sphi %s2335_s12, %s3202_s12  }
   0x3   : > { %p27_p1 = scmp.ge.s32.totalorder %s25_s15, 2  ;;  %p173_p2 = scmp.lt.s32.totalorder %s2308_s14, 3 }
   0x5   : > { %s3205_s15 = smov (%p27_p1, %s25_s15), 0  ;;  %p174_p3 = pnand %p2087_p0, %p173_p2 }
   0x6   : > { %p210_p4 = scmp.lt.s32.totalorder (!%p174_p3), %s2300_s12, 1  ;;  %s2622_s29 = smov (!%p174_p3), 0  }
   0x7   : > { %177 = sbr.rel (%p174_p3) target bundleno = 299 (0x12b), region = 32 }
   0xc   : > { %vm237_vm0 = vcmask 57344   ;;  %vm245_vm1 = vsmask.f32 256  ;;  %v247_v0 = vld [vmem:[#allocation2 + $0xc] sm:$0x1]  ;;  %vm234_vm2 = vcmask 60416  }
   0xd   : > { %vm2357_vm3 = vmand %vm237_vm0, %vm245_vm1  ;;  %v250_v2 = vld [vmem:[#allocation2 + $0x18] sm:$0x1]  ;;  %v253_v3 = vld [vmem:[#allocation2 + $0x24] sm:$0x1]  ;;  %vm295_vm4 = vsmask.f32 7938 }
   0xe   : > { %v248_v4 = vsel %vm2357_vm3, 0, %v247_v0  ;;  %v251_v5 = vsel %vm2357_vm3, 0, %v250_v2  ;;  %v254_v6 = vsel %vm2357_vm3, 0, %v253_v3  ;;  %v256_v7 = vld [vmem:[#allocation2 + $0x30] sm:$0x1]  ;;  %v2314_v11 = vmov 0   ;;  %vm2394_vm5 = vmand %vm237_vm0, %vm295_vm4 }
   0xf   : > { %249 = vst [vmem:[#allocation2 + $0xc] sm:$0x1] %v248_v4  ;;  %252 = vst [vmem:[#allocation2 + $0x18] sm:$0x1] %v251_v5  ;;  %v257_v8 = vsel %vm2357_vm3, 0, %v256_v7  ;;  %v2441_v4 = vld [vmem:[%s3191_s1] sm:$0xff] }
  0x10   : > { %255 = vst [vmem:[#allocation2 + $0x24] sm:$0x1] %v254_v6  ;;  %v259_v9 = vld [vmem:[#allocation2 + $0x3c] sm:$0x1]  ;;  %v262_v10 = vld [vmem:[#allocation2 + $0x48] sm:$0x1]  ;;  %vm2473_vm7 = vmand %vm234_vm2, %vm295_vm4 }
  0x11   : > { %235 = vst.msk [vmem:[#allocation2] sm:$0xf] %vm234_vm2, %v2314_v11  ;;  %236 = vst.msk [vmem:[#allocation2 + $0x4] sm:$0xf] %vm234_vm2, %v2314_v11  ;;  %v260_v12 = vsel %vm2357_vm3, 0, %v259_v9  ;;  %v263_v13 = vsel %vm2357_vm3, 0, %v262_v10 }
  0x12   : > { %238 = vst.msk [vmem:[#allocation2 + $0x8] sm:$0x1] %vm237_vm0, %v2314_v11  ;;  %242 = vst.msk [vmem:[#allocation2 + $0xd4] sm:$0x1] %vm237_vm0, %v2314_v11  ;;  %v265_v14 = vld [vmem:[#allocation2 + $0x54] sm:$0x1] }
  0x13   : > { %240 = vst.msk [vmem:[#allocation2 + $0xcc] sm:$0xf] %vm234_vm2, %v2314_v11  ;;  %241 = vst.msk [vmem:[#allocation2 + $0xd0] sm:$0xf] %vm234_vm2, %v2314_v11  ;;  %v268_v15 = vld [vmem:[#allocation2 + $0x60] sm:$0x1] }
  0x14   : > { %258 = vst [vmem:[#allocation2 + $0x30] sm:$0x1] %v257_v8  ;;  %261 = vst [vmem:[#allocation2 + $0x3c] sm:$0x1] %v260_v12  ;;  %v266_v16 = vsel %vm2357_vm3, 0, %v265_v14  ;;  %v269_v17 = vsel %vm2357_vm3, 0, %v268_v15 }
  0x15   : > { %264 = vst [vmem:[#allocation2 + $0x48] sm:$0x1] %v263_v13  ;;  %v271_v18 = vld [vmem:[#allocation2 + $0x6c] sm:$0x1]  ;;  %v274_v19 = vld [vmem:[#allocation2 + $0x78] sm:$0x1] }
  0x16   : > { %267 = vst [vmem:[#allocation2 + $0x54] sm:$0x1] %v266_v16  ;;  %270 = vst [vmem:[#allocation2 + $0x60] sm:$0x1] %v269_v17  ;;  %v272_v20 = vsel %vm2357_vm3, 0, %v271_v18  ;;  %v275_v21 = vsel %vm2357_vm3, 0, %v274_v19 }
  0x17   : > { %v277_v22 = vld [vmem:[#allocation2 + $0x84] sm:$0x1]  ;;  %v280_v23 = vld [vmem:[#allocation2 + $0x90] sm:$0x1]  ;;  %273 = vst [vmem:[#allocation2 + $0x6c] sm:$0x1] %v272_v20 }
  0x18   : > { %276 = vst [vmem:[#allocation2 + $0x78] sm:$0x1] %v275_v21  ;;  %v278_v24 = vsel %vm2357_vm3, 0, %v277_v22  ;;  %v281_v25 = vsel %vm2357_vm3, 0, %v280_v23  ;;  %v283_v26 = vld [vmem:[#allocation2 + $0x9c] sm:$0x1] }
  0x19   : > { %v286_v27 = vld [vmem:[#allocation2 + $0xa8] sm:$0x1]  ;;  %279 = vst [vmem:[#allocation2 + $0x84] sm:$0x1] %v278_v24  ;;  %282 = vst [vmem:[#allocation2 + $0x90] sm:$0x1] %v281_v25 }
  0x1a   : > { %v284_v29 = vsel %vm2357_vm3, 0, %v283_v26  ;;  %v287_v30 = vsel %vm2357_vm3, 0, %v286_v27  ;;  %v289_v31 = vld [vmem:[#allocation2 + $0xb4] sm:$0x1]  ;;  %v292_v32 = vld [vmem:[#allocation2 + $0xc0] sm:$0x1] }
  0x1b   : > { %285 = vst [vmem:[#allocation2 + $0x9c] sm:$0x1] %v284_v29  ;;  %288 = vst [vmem:[#allocation2 + $0xa8] sm:$0x1] %v287_v30  ;;  %v290_v33 = vsel %vm2357_vm3, 0, %v289_v31  ;;  %v293_v34 = vsel %vm2357_vm3, 0, %v292_v32 }
  0x1c   : > { %v297_v35 = vld [vmem:[#allocation2 + $0x14] sm:$0x1]  ;;  %v300_v36 = vld [vmem:[#allocation2 + $0x20] sm:$0x1]  ;;  %291 = vst [vmem:[#allocation2 + $0xb4] sm:$0x1] %v290_v33 }
  0x1d   : > { %294 = vst [vmem:[#allocation2 + $0xc0] sm:$0x1] %v293_v34  ;;  %v298_v37 = vsel %vm2394_vm5, 0, %v297_v35  ;;  %v301_v38 = vsel %vm2394_vm5, 0, %v300_v36  ;;  %v303_v39 = vld [vmem:[#allocation2 + $0x2c] sm:$0x1] }
  0x1e   : > { %v306_v40 = vld [vmem:[#allocation2 + $0x38] sm:$0x1]  ;;  %299 = vst [vmem:[#allocation2 + $0x14] sm:$0x1] %v298_v37  ;;  %302 = vst [vmem:[#allocation2 + $0x20] sm:$0x1] %v301_v38 }
  0x1f   : > { %v304_v41 = vsel %vm2394_vm5, 0, %v303_v39  ;;  %v307_v42 = vsel %vm2394_vm5, 0, %v306_v40  ;;  %v309_v43 = vld [vmem:[#allocation2 + $0x44] sm:$0x1]  ;;  %v312_v44 = vld [vmem:[#allocation2 + $0x50] sm:$0x1] }
  0x20   : > { %305 = vst [vmem:[#allocation2 + $0x2c] sm:$0x1] %v304_v41  ;;  %308 = vst [vmem:[#allocation2 + $0x38] sm:$0x1] %v307_v42  ;;  %v310_v45 = vsel %vm2394_vm5, 0, %v309_v43  ;;  %v313_v46 = vsel %vm2394_vm5, 0, %v312_v44 }
  0x21   : > { %v315_v47 = vld [vmem:[#allocation2 + $0x5c] sm:$0x1]  ;;  %v318_v48 = vld [vmem:[#allocation2 + $0x68] sm:$0x1]  ;;  %311 = vst [vmem:[#allocation2 + $0x44] sm:$0x1] %v310_v45 }
  0x22   : > { %314 = vst [vmem:[#allocation2 + $0x50] sm:$0x1] %v313_v46  ;;  %v316_v49 = vsel %vm2394_vm5, 0, %v315_v47  ;;  %v319_v50 = vsel %vm2394_vm5, 0, %v318_v48  ;;  %v321_v51 = vld [vmem:[#allocation2 + $0x74] sm:$0x1] }
  0x23   : > { %v324_v52 = vld [vmem:[#allocation2 + $0x80] sm:$0x1]  ;;  %317 = vst [vmem:[#allocation2 + $0x5c] sm:$0x1] %v316_v49  ;;  %320 = vst [vmem:[#allocation2 + $0x68] sm:$0x1] %v319_v50 }
  0x24   : > { %v322_v53 = vsel %vm2394_vm5, 0, %v321_v51  ;;  %v325_v54 = vsel %vm2394_vm5, 0, %v324_v52  ;;  %v327_v55 = vld [vmem:[#allocation2 + $0x8c] sm:$0x1]  ;;  %v330_v56 = vld [vmem:[#allocation2 + $0x98] sm:$0x1] }
  0x25   : > { %323 = vst [vmem:[#allocation2 + $0x74] sm:$0x1] %v322_v53  ;;  %326 = vst [vmem:[#allocation2 + $0x80] sm:$0x1] %v325_v54  ;;  %v328_v57 = vsel %vm2394_vm5, 0, %v327_v55  ;;  %v331_v58 = vsel %vm2394_vm5, 0, %v330_v56 }
  0x26   : > { %v333_v59 = vld [vmem:[#allocation2 + $0xa4] sm:$0x1]  ;;  %v336_v60 = vld [vmem:[#allocation2 + $0xb0] sm:$0x1]  ;;  %329 = vst [vmem:[#allocation2 + $0x8c] sm:$0x1] %v328_v57 }
  0x27   : > { %332 = vst [vmem:[#allocation2 + $0x98] sm:$0x1] %v331_v58  ;;  %v334_v61 = vsel %vm2394_vm5, 0, %v333_v59  ;;  %v337_v62 = vsel %vm2394_vm5, 0, %v336_v60  ;;  %v339_v63 = vld [vmem:[#allocation2 + $0xbc] sm:$0x1] }
  0x28   : > { %v342_v0 = vld [vmem:[#allocation2 + $0xc8] sm:$0x1]  ;;  %335 = vst [vmem:[#allocation2 + $0xa4] sm:$0x1] %v334_v61  ;;  %338 = vst [vmem:[#allocation2 + $0xb0] sm:$0x1] %v337_v62 }
  0x29   : > { %v340_v2 = vsel %vm2394_vm5, 0, %v339_v63  ;;  %v343_v3 = vsel %vm2394_vm5, 0, %v342_v0  ;;  %v2446_v5 = vld [vmem:[%s3191_s1 + $0x8] ss:$0 sm:$0xff]  ;;  %s3207_s12 = smov (!%p210_p4, %s2300_s12), 1 }
  0x2a   : > { %341 = vst [vmem:[#allocation2 + $0xbc] sm:$0x1] %v340_v2  ;;  %344 = vst [vmem:[#allocation2 + $0xc8] sm:$0x1] %v343_v3  ;;  %v2454_v6 = vld [vmem:[%s3192_s2] ss:$0 sm:$0xff] }
  0x2b   : > { %s2169_s22 = sshll.u32 %s3207_s12, 7  ;;  %vm377_vm6 = vsmask.f32 4368  ;;  %v701_v15 = vld [vmem:[#allocation2 + $0xc] sm:$0xf] }
  0x2c   : > { %s2459_s25 = scalar_lea.vmem %s3190_s0, %s2169_s22  ;;  %s2464_s28 = scalar_lea.vmem %s3193_s3, %s2169_s22  ;;  %vm2480_vm8 = vmor %vm245_vm1, %vm377_vm6  ;;  %v705_v28 = vld [vmem:[#allocation2 + $0x14] sm:$0x1]  ;;  %v708_v37 = vld [vmem:[#allocation2 + $0x18] sm:$0xf] }
  0x2d   : > { %v345_v7 = vld [vmem:[%s2459_s25] sm:$0xf]  ;;  %v346_v8 = vld [vmem:[%s2459_s25 + $0x4] sm:$0xf]  ;;  %v347_v9 = vld [vmem:[%s2459_s25 + $0x8] sm:$0xf] }
  0x2e   : > { %v380_v10 = vshrl.u32 %v345_v7, 16  ;;  %v383_v11 = vshll.u32 %v345_v7, 16  ;;  %v388_v12 = vshrl.u32 %v346_v8, 16  ;;  %v391_v13 = vshll.u32 %v346_v8, 16  ;;  %v348_v14 = vld [vmem:[%s2459_s25 + $0xc] sm:$0xf] }
  0x2f   : > { %v397_v16 = vshrl.u32 %v347_v9, 16  ;;  %v400_v17 = vshll.u32 %v347_v9, 16  ;;  %v405_v18 = vshrl.u32 %v348_v14, 16  ;;  %v408_v19 = vshll.u32 %v348_v14, 16  ;;  %v349_v20 = vld [vmem:[%s2459_s25 + $0x10] sm:$0xf] }
  0x30   : > { %v382_v22 = vrot.slane %v380_v10, 7  ;;  %v390_v23 = vrot.slane %v388_v12, 7  ;;  %v414_v24 = vshrl.u32 %v349_v20, 16  ;;  %v417_v25 = vshll.u32 %v349_v20, 16  ;;  %v350_v26 = vld [vmem:[%s2459_s25 + $0x14] sm:$0xf] }
  0x31   : > { %v399_v29 = vrot.slane %v397_v16, 7  ;;  %v407_v30 = vrot.slane %v405_v18, 7  ;;  %v422_v31 = vshrl.u32 %v350_v26, 16  ;;  %v425_v32 = vshll.u32 %v350_v26, 16  ;;  %v712_v38 = vld [vmem:[#allocation2 + $0x20] sm:$0x1] }
  0x32   : > { %v385_v33 = vor.u32 %v383_v11, %v382_v22  ;;  %v386_v34 = vrot.slane %v382_v22, 4  ;;  %v393_v35 = vor.u32 %v391_v13, %v390_v23  ;;  %v395_v36 = vrot.slane %v390_v23, 4  ;;  %v351_v43 = vld [vmem:[%s2459_s25 + $0x18] sm:$0xf]  ;;  %v715_v48 = vld [vmem:[#allocation2 + $0x24] sm:$0xf] }
  0x33   : > { %v402_v39 = vor.u32 %v400_v17, %v399_v29  ;;  %v403_v40 = vrot.slane %v399_v29, 4  ;;  %v410_v41 = vor.u32 %v408_v19, %v407_v30  ;;  %v412_v42 = vrot.slane %v407_v30, 4  ;;  %v352_v49 = vld [vmem:[%s2459_s25 + $0x1c] sm:$0xf]  ;;  %v719_v54 = vld [vmem:[#allocation2 + $0x2c] sm:$0x1] }
  0x34   : > { %v702_v44 = vsel %vm2473_vm7, %v385_v33, %v701_v15  ;;  %v394_v45 = vsel %vm2480_vm8, %v386_v34, %v393_v35  ;;  %v706_v46 = vsel %vm2357_vm3, %v395_v36, %v705_v28  ;;  %v416_v47 = vrot.slane %v414_v24, 7  ;;  %v353_v55 = vld [vmem:[%s2459_s25 + $0x20] sm:$0xf]  ;;  %v354_v60 = vld [vmem:[%s2459_s25 + $0x24] sm:$0xf] }
  0x35   : > { %703 = vst [vmem:[#allocation2 + $0xc] sm:$0xf] %v702_v44  ;;  %704 = vst.msk [vmem:[#allocation2 + $0x10] sm:$0xf] %vm234_vm2, %v394_v45  ;;  %v709_v50 = vsel %vm2473_vm7, %v402_v39, %v708_v37  ;;  %v411_v51 = vsel %vm2480_vm8, %v403_v40, %v410_v41  ;;  %v713_v52 = vsel %vm2357_vm3, %v412_v42, %v712_v38  ;;  %v424_v53 = vrot.slane %v422_v31, 7 }
  0x36   : > { %707 = vst [vmem:[#allocation2 + $0x14] sm:$0x1] %v706_v46  ;;  %710 = vst [vmem:[#allocation2 + $0x18] sm:$0xf] %v709_v50  ;;  %v419_v56 = vor.u32 %v417_v25, %v416_v47  ;;  %v420_v57 = vrot.slane %v416_v47, 4  ;;  %v431_v58 = vshrl.u32 %v351_v43, 16 }
  0x37   : > { %711 = vst.msk [vmem:[#allocation2 + $0x1c] sm:$0xf] %vm234_vm2, %v411_v51  ;;  %714 = vst [vmem:[#allocation2 + $0x20] sm:$0x1] %v713_v52  ;;  %v434_v59 = vshll.u32 %v351_v43, 16  ;;  %v427_v61 = vor.u32 %v425_v32, %v424_v53  ;;  %v429_v62 = vrot.slane %v424_v53, 4 }
  0x38   : > { %v439_v63 = vshrl.u32 %v352_v49, 16  ;;  %v442_v0 = vshll.u32 %v352_v49, 16  ;;  %v716_v2 = vsel %vm2473_vm7, %v419_v56, %v715_v48  ;;  %v433_v3 = vrot.slane %v431_v58, 7  ;;  %v355_v9 = vld [vmem:[%s2459_s25 + $0x28] sm:$0xf] }
  0x39   : > { %v448_v7 = vshrl.u32 %v353_v55, 16  ;;  %v451_v8 = vshll.u32 %v353_v55, 16  ;;  %717 = vst [vmem:[#allocation2 + $0x24] sm:$0xf] %v716_v2  ;;  %v428_v10 = vsel %vm2480_vm8, %v420_v57, %v427_v61  ;;  %v720_v11 = vsel %vm2357_vm3, %v429_v62, %v719_v54  ;;  %v722_v12 = vld [vmem:[#allocation2 + $0x30] sm:$0xf] }
  0x3a   : > { %v441_v13 = vrot.slane %v439_v63, 7  ;;  %v726_v14 = vld [vmem:[#allocation2 + $0x38] sm:$0x1]  ;;  %v456_v15 = vshrl.u32 %v354_v60, 16  ;;  %718 = vst.msk [vmem:[#allocation2 + $0x28] sm:$0xf] %vm234_vm2, %v428_v10  ;;  %v436_v16 = vor.u32 %v434_v59, %v433_v3 }
  0x3b   : > { %721 = vst [vmem:[#allocation2 + $0x2c] sm:$0x1] %v720_v11  ;;  %v437_v17 = vrot.slane %v433_v3, 4  ;;  %v450_v18 = vrot.slane %v448_v7, 7  ;;  %v729_v19 = vld [vmem:[#allocation2 + $0x3c] sm:$0xf] }
  0x3c   : > { %v459_v20 = vshll.u32 %v354_v60, 16  ;;  %v444_v22 = vor.u32 %v442_v0, %v441_v13  ;;  %v446_v23 = vrot.slane %v441_v13, 4  ;;  %v458_v24 = vrot.slane %v456_v15, 7  ;;  %v356_v26 = vld [vmem:[%s2459_s25 + $0x2c] sm:$0xf] }
  0x3d   : > { %v465_v25 = vshrl.u32 %v355_v9, 16  ;;  %v723_v28 = vsel %vm2473_vm7, %v436_v16, %v722_v12  ;;  %v453_v29 = vor.u32 %v451_v8, %v450_v18  ;;  %v454_v30 = vrot.slane %v450_v18, 4  ;;  %v733_v31 = vld [vmem:[#allocation2 + $0x44] sm:$0x1]  ;;  %v357_v33 = vld [vmem:[%s2459_s25 + $0x30] sm:$0xf] }
  0x3e   : > { %v468_v32 = vshll.u32 %v355_v9, 16  ;;  %724 = vst [vmem:[#allocation2 + $0x30] sm:$0xf] %v723_v28  ;;  %v445_v34 = vsel %vm2480_vm8, %v437_v17, %v444_v22  ;;  %v727_v35 = vsel %vm2357_vm3, %v446_v23, %v726_v14  ;;  %v461_v36 = vor.u32 %v459_v20, %v458_v24  ;;  %v358_v38 = vld [vmem:[%s2459_s25 + $0x34] sm:$0xf] }
  0x3f   : > { %v463_v37 = vrot.slane %v458_v24, 4  ;;  %725 = vst.msk [vmem:[#allocation2 + $0x34] sm:$0xf] %vm234_vm2, %v445_v34  ;;  %728 = vst [vmem:[#allocation2 + $0x38] sm:$0x1] %v727_v35  ;;  %v730_v39 = vsel %vm2473_vm7, %v453_v29, %v729_v19  ;;  %v467_v40 = vrot.slane %v465_v25, 7 }
  0x40   : > { %v473_v41 = vshrl.u32 %v356_v26, 16  ;;  %v476_v42 = vshll.u32 %v356_v26, 16  ;;  %v359_v43 = vld [vmem:[%s2459_s25 + $0x38] sm:$0xf]  ;;  %731 = vst [vmem:[#allocation2 + $0x3c] sm:$0xf] %v730_v39  ;;  %v462_v44 = vsel %vm2480_vm8, %v454_v30, %v461_v36 }
  0x41   : > { %v734_v45 = vsel %vm2357_vm3, %v463_v37, %v733_v31  ;;  %v736_v46 = vld [vmem:[#allocation2 + $0x48] sm:$0xf]  ;;  %v482_v47 = vshrl.u32 %v357_v33, 16  ;;  %v485_v48 = vshll.u32 %v357_v33, 16  ;;  %732 = vst.msk [vmem:[#allocation2 + $0x40] sm:$0xf] %vm234_vm2, %v462_v44  ;;  %v470_v49 = vor.u32 %v468_v32, %v467_v40 }
  0x42   : > { %735 = vst [vmem:[#allocation2 + $0x44] sm:$0x1] %v734_v45  ;;  %v471_v50 = vrot.slane %v467_v40, 4  ;;  %v475_v51 = vrot.slane %v473_v41, 7  ;;  %v490_v52 = vshrl.u32 %v358_v38, 16  ;;  %v493_v56 = vshll.u32 %v358_v38, 16 }
  0x43   : > { %v360_v53 = vld [vmem:[%s2459_s25 + $0x3c] sm:$0xf]  ;;  %v740_v54 = vld [vmem:[#allocation2 + $0x50] sm:$0x1]  ;;  %v484_v55 = vrot.slane %v482_v47, 7  ;;  %v499_v57 = vshrl.u32 %v359_v43, 16  ;;  %v737_v59 = vsel %vm2473_vm7, %v470_v49, %v736_v46 }
  0x44   : > { %v502_v58 = vshll.u32 %v359_v43, 16  ;;  %v478_v60 = vor.u32 %v476_v42, %v475_v51  ;;  %v480_v61 = vrot.slane %v475_v51, 4  ;;  %v743_v62 = vld [vmem:[#allocation2 + $0x54] sm:$0xf]  ;;  %v492_v63 = vrot.slane %v490_v52, 7 }
  0x45   : > { %v747_v0 = vld [vmem:[#allocation2 + $0x5c] sm:$0x1]  ;;  %738 = vst [vmem:[#allocation2 + $0x48] sm:$0xf] %v737_v59  ;;  %v487_v2 = vor.u32 %v485_v48, %v484_v55  ;;  %v488_v3 = vrot.slane %v484_v55, 4  ;;  %v501_v7 = vrot.slane %v499_v57, 7 }
  0x46   : > { %v507_v8 = vshrl.u32 %v360_v53, 16  ;;  %v361_v9 = vld [vmem:[%s2459_s25 + $0x40] sm:$0xf]  ;;  %v479_v10 = vsel %vm2480_vm8, %v471_v50, %v478_v60  ;;  %v741_v11 = vsel %vm2357_vm3, %v480_v61, %v740_v54  ;;  %v495_v12 = vor.u32 %v493_v56, %v492_v63  ;;  %v362_v15 = vld [vmem:[%s2459_s25 + $0x44] sm:$0xf] }
  0x47   : > { %v497_v13 = vrot.slane %v492_v63, 4  ;;  %v750_v14 = vld [vmem:[#allocation2 + $0x60] sm:$0xf]  ;;  %739 = vst.msk [vmem:[#allocation2 + $0x4c] sm:$0xf] %vm234_vm2, %v479_v10  ;;  %v744_v16 = vsel %vm2473_vm7, %v487_v2, %v743_v62  ;;  %v504_v17 = vor.u32 %v502_v58, %v501_v7  ;;  %v505_v18 = vrot.slane %v501_v7, 4 }
  0x48   : > { %742 = vst [vmem:[#allocation2 + $0x50] sm:$0x1] %v741_v11  ;;  %v509_v19 = vrot.slane %v507_v8, 7  ;;  %v363_v20 = vld [vmem:[%s2459_s25 + $0x48] sm:$0xf]  ;;  %v496_v22 = vsel %vm2480_vm8, %v488_v3, %v495_v12  ;;  %v510_v24 = vshll.u32 %v360_v53, 16 }
  0x49   : > { %745 = vst [vmem:[#allocation2 + $0x54] sm:$0xf] %v744_v16  ;;  %v748_v23 = vsel %vm2357_vm3, %v497_v13, %v747_v0  ;;  %v754_v25 = vld [vmem:[#allocation2 + $0x68] sm:$0x1]  ;;  %v516_v26 = vshrl.u32 %v361_v9, 16  ;;  %v751_v29 = vsel %vm2473_vm7, %v504_v17, %v750_v14  ;;  %v519_v31 = vshll.u32 %v361_v9, 16 }
  0x4a   : > { %v364_v28 = vld [vmem:[%s2459_s25 + $0x4c] sm:$0xf]  ;;  %746 = vst.msk [vmem:[#allocation2 + $0x58] sm:$0xf] %vm234_vm2, %v496_v22  ;;  %749 = vst [vmem:[#allocation2 + $0x5c] sm:$0x1] %v748_v23  ;;  %v512_v33 = vor.u32 %v510_v24, %v509_v19 }
  0x4b   : > { %v514_v30 = vrot.slane %v509_v19, 4  ;;  %v524_v32 = vshrl.u32 %v362_v15, 16  ;;  %752 = vst [vmem:[#allocation2 + $0x60] sm:$0xf] %v751_v29  ;;  %v518_v34 = vrot.slane %v516_v26, 7  ;;  %v527_v36 = vshll.u32 %v362_v15, 16 }
  0x4c   : > { %v757_v35 = vld [vmem:[#allocation2 + $0x6c] sm:$0xf]  ;;  %v533_v37 = vshrl.u32 %v363_v20, 16  ;;  %v536_v40 = vshll.u32 %v363_v20, 16  ;;  %v541_v41 = vshrl.u32 %v364_v28, 16  ;;  %v513_v43 = vsel %vm2480_vm8, %v505_v18, %v512_v33 }
  0x4d   : > { %v755_v38 = vsel %vm2357_vm3, %v514_v30, %v754_v25  ;;  %v526_v39 = vrot.slane %v524_v32, 7  ;;  %v365_v42 = vld [vmem:[%s2459_s25 + $0x50] sm:$0xf]  ;;  %v521_v44 = vor.u32 %v519_v31, %v518_v34  ;;  %v522_v45 = vrot.slane %v518_v34, 4  ;;  %v761_v46 = vld [vmem:[#allocation2 + $0x74] sm:$0x1] }
  0x4e   : > { %756 = vst [vmem:[#allocation2 + $0x68] sm:$0x1] %v755_v38  ;;  %v535_v47 = vrot.slane %v533_v37, 7  ;;  %v764_v48 = vld [vmem:[#allocation2 + $0x78] sm:$0xf]  ;;  %v543_v51 = vrot.slane %v541_v41, 7 }
  0x4f   : > { %753 = vst.msk [vmem:[#allocation2 + $0x64] sm:$0xf] %vm234_vm2, %v513_v43  ;;  %v529_v49 = vor.u32 %v527_v36, %v526_v39  ;;  %v531_v50 = vrot.slane %v526_v39, 4  ;;  %v544_v52 = vshll.u32 %v364_v28, 16  ;;  %v366_v53 = vld [vmem:[%s2459_s25 + $0x54] sm:$0xf]  ;;  %v758_v54 = vsel %vm2473_vm7, %v521_v44, %v757_v35 }
  0x50   : > { %v538_v55 = vor.u32 %v536_v40, %v535_v47  ;;  %v539_v56 = vrot.slane %v535_v47, 4  ;;  %v768_v57 = vld [vmem:[#allocation2 + $0x80] sm:$0x1]  ;;  %v550_v58 = vshrl.u32 %v365_v42, 16  ;;  %v367_v59 = vld [vmem:[%s2459_s25 + $0x58] sm:$0xf] }
  0x51   : > { %759 = vst [vmem:[#allocation2 + $0x6c] sm:$0xf] %v758_v54  ;;  %v530_v60 = vsel %vm2480_vm8, %v522_v45, %v529_v49  ;;  %v762_v61 = vsel %vm2357_vm3, %v531_v50, %v761_v46  ;;  %v546_v62 = vor.u32 %v544_v52, %v543_v51  ;;  %v548_v63 = vrot.slane %v543_v51, 4  ;;  %v368_v0 = vld [vmem:[%s2459_s25 + $0x5c] sm:$0xf] }
  0x52   : > { %760 = vst.msk [vmem:[#allocation2 + $0x70] sm:$0xf] %vm234_vm2, %v530_v60  ;;  %763 = vst [vmem:[#allocation2 + $0x74] sm:$0x1] %v762_v61  ;;  %v765_v2 = vsel %vm2473_vm7, %v538_v55, %v764_v48  ;;  %v552_v3 = vrot.slane %v550_v58, 7  ;;  %v553_v7 = vshll.u32 %v365_v42, 16 }
  0x53   : > { %v558_v8 = vshrl.u32 %v366_v53, 16  ;;  %v369_v9 = vld [vmem:[%s2459_s25 + $0x60] sm:$0xf]  ;;  %766 = vst [vmem:[#allocation2 + $0x78] sm:$0xf] %v765_v2  ;;  %v547_v10 = vsel %vm2480_vm8, %v539_v56, %v546_v62  ;;  %v769_v11 = vsel %vm2357_vm3, %v548_v63, %v768_v57  ;;  %v561_v13 = vshll.u32 %v366_v53, 16 }
  0x54   : > { %v771_v12 = vld [vmem:[#allocation2 + $0x84] sm:$0xf]  ;;  %v567_v14 = vshrl.u32 %v367_v59, 16  ;;  %767 = vst.msk [vmem:[#allocation2 + $0x7c] sm:$0xf] %vm234_vm2, %v547_v10  ;;  %v555_v15 = vor.u32 %v553_v7, %v552_v3  ;;  %v556_v16 = vrot.slane %v552_v3, 4 }
  0x55   : > { %770 = vst [vmem:[#allocation2 + $0x80] sm:$0x1] %v769_v11  ;;  %v560_v17 = vrot.slane %v558_v8, 7  ;;  %v775_v18 = vld [vmem:[#allocation2 + $0x8c] sm:$0x1]  ;;  %v570_v19 = vshll.u32 %v367_v59, 16 }
  0x56   : > { %v569_v20 = vrot.slane %v567_v14, 7  ;;  %v575_v22 = vshrl.u32 %v368_v0, 16  ;;  %v578_v23 = vshll.u32 %v368_v0, 16  ;;  %v584_v24 = vshrl.u32 %v369_v9, 16  ;;  %v370_v25 = vld [vmem:[%s2459_s25 + $0x64] sm:$0xf] }
  0x57   : > { %v772_v26 = vsel %vm2473_vm7, %v555_v15, %v771_v12  ;;  %v563_v28 = vor.u32 %v561_v13, %v560_v17  ;;  %v565_v29 = vrot.slane %v560_v17, 4  ;;  %v778_v30 = vld [vmem:[#allocation2 + $0x90] sm:$0xf]  ;;  %v782_v31 = vld [vmem:[#allocation2 + $0x98] sm:$0x1]  ;;  %v587_v32 = vshll.u32 %v369_v9, 16 }
  0x58   : > { %773 = vst [vmem:[#allocation2 + $0x84] sm:$0xf] %v772_v26  ;;  %v572_v33 = vor.u32 %v570_v19, %v569_v20  ;;  %v573_v34 = vrot.slane %v569_v20, 4  ;;  %v577_v35 = vrot.slane %v575_v22, 7  ;;  %v586_v36 = vrot.slane %v584_v24, 7 }
  0x59   : > { %v371_v37 = vld [vmem:[%s2459_s25 + $0x68] sm:$0xf]  ;;  %v564_v38 = vsel %vm2480_vm8, %v556_v16, %v563_v28  ;;  %v776_v39 = vsel %vm2357_vm3, %v565_v29, %v775_v18  ;;  %v785_v40 = vld [vmem:[#allocation2 + $0x9c] sm:$0xf]  ;;  %v592_v41 = vshrl.u32 %v370_v25, 16  ;;  %v595_v42 = vshll.u32 %v370_v25, 16 }
  0x5a   : > { %v372_v43 = vld [vmem:[%s2459_s25 + $0x6c] sm:$0xf]  ;;  %774 = vst.msk [vmem:[#allocation2 + $0x88] sm:$0xf] %vm234_vm2, %v564_v38  ;;  %777 = vst [vmem:[#allocation2 + $0x8c] sm:$0x1] %v776_v39  ;;  %v779_v44 = vsel %vm2473_vm7, %v572_v33, %v778_v30  ;;  %v580_v45 = vor.u32 %v578_v23, %v577_v35  ;;  %v589_v47 = vor.u32 %v587_v32, %v586_v36 }
  0x5b   : > { %v582_v46 = vrot.slane %v577_v35, 4  ;;  %v373_v48 = vld [vmem:[%s2459_s25 + $0x70] sm:$0xf]  ;;  %780 = vst [vmem:[#allocation2 + $0x90] sm:$0xf] %v779_v44  ;;  %v590_v49 = vrot.slane %v586_v36, 4 }
  0x5c   : > { %v594_v50 = vrot.slane %v592_v41, 7  ;;  %v601_v51 = vshrl.u32 %v371_v37, 16  ;;  %v604_v52 = vshll.u32 %v371_v37, 16  ;;  %v374_v53 = vld [vmem:[%s2459_s25 + $0x74] sm:$0xf]  ;;  %v581_v54 = vsel %vm2480_vm8, %v573_v34, %v580_v45 }
  0x5d   : > { %v783_v55 = vsel %vm2357_vm3, %v582_v46, %v782_v31  ;;  %v786_v56 = vsel %vm2473_vm7, %v589_v47, %v785_v40  ;;  %v789_v57 = vld [vmem:[#allocation2 + $0xa4] sm:$0x1]  ;;  %v609_v58 = vshrl.u32 %v372_v43, 16  ;;  %781 = vst.msk [vmem:[#allocation2 + $0x94] sm:$0xf] %vm234_vm2, %v581_v54  ;;  %v612_v63 = vshll.u32 %v372_v43, 16 }
  0x5e   : > { %784 = vst [vmem:[#allocation2 + $0x98] sm:$0x1] %v783_v55  ;;  %787 = vst [vmem:[#allocation2 + $0x9c] sm:$0xf] %v786_v56  ;;  %v597_v59 = vor.u32 %v595_v42, %v594_v50  ;;  %v599_v60 = vrot.slane %v594_v50, 4  ;;  %v603_v61 = vrot.slane %v601_v51, 7 }
  0x5f   : > { %v792_v62 = vld [vmem:[#allocation2 + $0xa8] sm:$0xf]  ;;  %v611_v0 = vrot.slane %v609_v58, 7  ;;  %v618_v2 = vshrl.u32 %v373_v48, 16  ;;  %v621_v3 = vshll.u32 %v373_v48, 16  ;;  %v626_v7 = vshrl.u32 %v374_v53, 16 }
  0x60   : > { %v375_v8 = vld [vmem:[%s2459_s25 + $0x78] sm:$0xf]  ;;  %v598_v9 = vsel %vm2480_vm8, %v590_v49, %v597_v59  ;;  %v790_v10 = vsel %vm2357_vm3, %v599_v60, %v789_v57  ;;  %v606_v11 = vor.u32 %v604_v52, %v603_v61  ;;  %v607_v12 = vrot.slane %v603_v61, 4  ;;  %v796_v13 = vld [vmem:[#allocation2 + $0xb0] sm:$0x1] }
  0x61   : > { %788 = vst.msk [vmem:[#allocation2 + $0xa0] sm:$0xf] %vm234_vm2, %v598_v9  ;;  %791 = vst [vmem:[#allocation2 + $0xa4] sm:$0x1] %v790_v10  ;;  %v614_v14 = vor.u32 %v612_v63, %v611_v0  ;;  %v616_v15 = vrot.slane %v611_v0, 4  ;;  %v620_v16 = vrot.slane %v618_v2, 7 }
  0x62   : > { %v628_v17 = vrot.slane %v626_v7, 7  ;;  %v376_v18 = vld [vmem:[%s2459_s25 + $0x7c] sm:$0xf]  ;;  %v793_v19 = vsel %vm2473_vm7, %v606_v11, %v792_v62  ;;  %v799_v20 = vld [vmem:[#allocation2 + $0xb4] sm:$0xf]  ;;  %v629_v22 = vshll.u32 %v374_v53, 16 }
  0x63   : > { %v635_v23 = vshrl.u32 %v375_v8, 16  ;;  %v638_v24 = vshll.u32 %v375_v8, 16  ;;  %794 = vst [vmem:[#allocation2 + $0xa8] sm:$0xf] %v793_v19  ;;  %v615_v25 = vsel %vm2480_vm8, %v607_v12, %v614_v14  ;;  %v797_v26 = vsel %vm2357_vm3, %v616_v15, %v796_v13  ;;  %v803_v30 = vld [vmem:[#allocation2 + $0xbc] sm:$0x1] }
  0x64   : > { %v623_v28 = vor.u32 %v621_v3, %v620_v16  ;;  %v624_v29 = vrot.slane %v620_v16, 4  ;;  %795 = vst.msk [vmem:[#allocation2 + $0xac] sm:$0xf] %vm234_vm2, %v615_v25  ;;  %798 = vst [vmem:[#allocation2 + $0xb0] sm:$0x1] %v797_v26  ;;  %v631_v31 = vor.u32 %v629_v22, %v628_v17  ;;  %v633_v32 = vrot.slane %v628_v17, 4 }
  0x65   : > { %v637_v33 = vrot.slane %v635_v23, 7  ;;  %v643_v34 = vshrl.u32 %v376_v18, 16  ;;  %v806_v36 = vld [vmem:[#allocation2 + $0xc0] sm:$0xf]  ;;  %v646_v37 = vshll.u32 %v376_v18, 16 }
  0x66   : > { %v800_v35 = vsel %vm2473_vm7, %v623_v28, %v799_v20  ;;  %v632_v38 = vsel %vm2480_vm8, %v624_v29, %v631_v31  ;;  %v804_v39 = vsel %vm2357_vm3, %v633_v32, %v803_v30  ;;  %v810_v44 = vld [vmem:[#allocation2 + $0xc8] sm:$0x1] }
  0x67   : > { %801 = vst [vmem:[#allocation2 + $0xb4] sm:$0xf] %v800_v35  ;;  %v640_v40 = vor.u32 %v638_v24, %v637_v33  ;;  %802 = vst.msk [vmem:[#allocation2 + $0xb8] sm:$0xf] %vm234_vm2, %v632_v38  ;;  %v641_v41 = vrot.slane %v637_v33, 4  ;;  %v645_v42 = vrot.slane %v643_v34, 7 }
  0x68   : > { %805 = vst [vmem:[#allocation2 + $0xbc] sm:$0x1] %v804_v39 }
  0x69   : > { %v807_v43 = vsel %vm2473_vm7, %v640_v40, %v806_v36  ;;  %v648_v45 = vor.u32 %v646_v37, %v645_v42  ;;  %v650_v46 = vrot.slane %v645_v42, 4 }
  0x6a   : > { %808 = vst [vmem:[#allocation2 + $0xc0] sm:$0xf] %v807_v43 }
  0x6b   : > { %v649_v47 = vsel %vm2480_vm8, %v641_v41, %v648_v45  ;;  %v811_v48 = vsel %vm2357_vm3, %v650_v46, %v810_v44 }
  0x6c   : > { %809 = vst.msk [vmem:[#allocation2 + $0xc4] sm:$0xf] %vm234_vm2, %v649_v47  ;;  %812 = vst [vmem:[#allocation2 + $0xc8] sm:$0x1] %v811_v48 }
  0x6d LB: >> { %v874_v21 = vlaneseq  ;;  %s2171_s30 = smul.u32 96, %s2312_s29  ;;  %vm962_vm9 = vcmask 1046528   ;;  %vm1087_vm10 = vcmask 1045504   ;;  %s2189_s5 = sshll.u32 %s2312_s29, 6  ;;  %s2312_s29 = sphi %s2622_s29, %s821_s29  }
  0x6e   : >> { %s2734_s6 = scalar_lea.vmem %s2464_s28, %s2189_s5  ;;  %s821_s29 = sadd.s32 1, %s2312_s29  }
  0x6f   : >> { %v875_v49 = vshrl.u32 %v874_v21, 7  ;;  %s2628_s4 = scalar_lea.vmem [#allocation2], %s2171_s30  ;;  %p818_p5 = scmp.ge.s32.totalorder %s821_s29, 2  }
  0x71   : >> { %v876_v27 = vsub.s32 0, %v875_v49  ;;  %v912_v50 = vsub.s32 1, %v875_v49  ;;  %v1037_v51 = vsub.s32 2, %v875_v49  ;;  %v1214_v1 = vsub.s32 3, %v875_v49 }
  0x72   : >> { %v1250_v54 = vsub.s32 4, %v875_v49  ;;  %v1374_v55 = vsub.s32 5, %v875_v49  ;;  %v1550_v56 = vsub.s32 6, %v875_v49  ;;  %v1586_v36 = vsub.s32 7, %v875_v49 }
  0x73   : >> { %v2191_v52 = vld [vmem:[%s2628_s4] sm:$0xff]   ;;  %v2097_v53 = vld [vmem:[%s2628_s4 + $0xc] sm:$0xff]   ;;  %v2633_v59 = vrot.slane %v2441_v4, %v876_v27  ;;  %v2636_v60 = vrot.slane %v2441_v4, %v912_v50  ;;  %v2639_v61 = vrot.slane %v2441_v4, %v1037_v51  ;;  %v2642_v0 = vrot.slane %v2441_v4, %v1214_v1  ;;  %v2245_v13 = vld [vmem:[%s2628_s4 + $0x18] sm:$0xff]  }
  0x74   : >> { %v2192_v57 = vunpack.c.l.bf16 %v2191_v52  ;;  %v2193_v58 = vunpack.c.h.bf16 %v2191_v52  ;;  %v1188_v62 = vunpack.c.l.bf16 %v2097_v53  ;;  %v1189_v63 = vunpack.c.h.bf16 %v2097_v53  ;;  %v828_v28 = vld [vmem:[%s2628_s4 + $0x8] sm:$0x1]  ;;  %v2099_v41 = vld [vmem:[%s2628_s4 + $0x14] sm:$0x1] }
  0x75   : >> { %v2648_v8 = vrot.slane %v2441_v4, %v1250_v54  ;;  %v2654_v12 = vrot.slane %v2441_v4, %v1374_v55  ;;  %v2662_v26 = vunpack.c.l.bf16 %v2245_v13  ;;  %v2667_v34 = vunpack.c.h.bf16 %v2245_v13  ;;  %v2125_v55 = vld [vmem:[%s2628_s4 + $0x20] sm:$0x1] }
  0x76   : >> { %v878_v2 = vmul.f32 %v2192_v57, %v2633_v59  ;;  %v914_v3 = vmul.f32 %v2192_v57, %v2636_v60  ;;  %v915_v7 = vmul.f32 %v2193_v58, %v2636_v60  ;;  %v1039_v9 = vmul.f32 %v2192_v57, %v2639_v61 }
  0x77   : >> { %v1040_v10 = vmul.f32 %v2193_v58, %v2639_v61  ;;  %v1216_v11 = vmul.f32 %v2642_v0, %v1188_v62  ;;  %v1252_v16 = vmul.f32 %v2648_v8, %v1188_v62  ;;  %v1253_v17 = vmul.f32 %v2648_v8, %v1189_v63 }
  0x78   : >> { %v963_v14 = vrot.slane %v914_v3, 1  ;;  %v964_v15 = vrot.slane %v915_v7, 1  ;;  %v1088_v18 = vrot.slane %v1039_v9, 2  ;;  %v1376_v20 = vmul.f32 %v2654_v12, %v1188_v62 }
  0x79   : >> { %v1089_v19 = vrot.slane %v1040_v10, 2  ;;  %v1377_v22 = vmul.f32 %v2654_v12, %v1189_v63  ;;  %v1300_v24 = vrot.slane %v1252_v16, 1  ;;  %v1301_v25 = vrot.slane %v1253_v17, 1 }
  0x7a   : >> { %v965_v23 = vsel %vm962_vm9, %v963_v14, %v964_v15  ;;  %v1424_v31 = vrot.slane %v1376_v20, 2  ;;  %v2670_v35 = vrot.slane %v2441_v4, %v1550_v56  ;;  %v1712_v39 = vmul.f32 %v2662_v26, %v2446_v5 }
  0x7b   : >> { %v1019_v29 = vadd.f32 %v965_v23, %v878_v2  ;;  %v1090_v30 = vsel %vm1087_vm10, %v1088_v18, %v1089_v19  ;;  %v1425_v32 = vrot.slane %v1377_v22, 2  ;;  %v1302_v33 = vsel %vm962_vm9, %v1300_v24, %v1301_v25  ;;  %v829_v2 = vld [vmem:[%s2628_s4 + $0xc] sm:$0xff]  }
  0x7c   : >> { %v852_v40 = vunpack.c.l.bf16 %v828_v28  ;;  %v1552_v42 = vmul.f32 %v2662_v26, %v2670_v35  ;;  %v2679_v43 = vrot.slane %v2441_v4, %v1586_v36  ;;  %v1713_v44 = vmul.f32 %v2667_v34, %v2446_v5 }
  0x7d   : >> { %v1144_v37 = vadd.f32 %v1090_v30, %v1019_v29  ;;  %v1426_v38 = vsel %vm1087_vm10, %v1424_v31, %v1425_v32  ;;  %v879_v45 = vmul.f32 %v2193_v58, %v2633_v59  ;;  %v1760_v47 = vrot.slane %v1712_v39, 2 }
  0x7e   : >> { %v916_v48 = vmul.f32 %v2636_v60, %v852_v40  ;;  %v1041_v21 = vmul.f32 %v2639_v61, %v852_v40  ;;  %v1588_v49 = vmul.f32 %v2662_v26, %v2679_v43  ;;  %v1589_v27 = vmul.f32 %v2667_v34, %v2679_v43 }
  0x7f   : >> { %v1232_v46 = vadd.f32 %v1216_v11, %v1144_v37  ;;  %v1761_v50 = vrot.slane %v1713_v44, 2  ;;  %v1190_v51 = vunpack.c.l.bf16 %v2099_v41  ;;  %v1217_v54 = vmul.f32 %v2642_v0, %v1189_v63 }
  0x80   : >> { %v966_v52 = vrot.slane %v916_v48, 1  ;;  %v1091_v53 = vrot.slane %v1041_v21, 2  ;;  %v1636_v56 = vrot.slane %v1588_v49, 1  ;;  %v1637_v57 = vrot.slane %v1589_v27, 1 }
  0x81   : >> { %v1356_v1 = vadd.f32 %v1302_v33, %v1232_v46  ;;  %v1762_v58 = vsel %vm1087_vm10, %v1760_v47, %v1761_v50  ;;  %v1254_v62 = vmul.f32 %v2648_v8, %v1190_v51  ;;  %v1378_v10 = vmul.f32 %v2654_v12, %v1190_v51  ;;  %v2126_v51 = vld [vmem:[%s2628_s4 + $0x24] sm:$0xff]  }
  0x82   : >> { %v967_v7 = vsel %vm962_vm9, %v964_v15, %v966_v52  ;;  %v1092_v9 = vsel %vm1087_vm10, %v1089_v19, %v1091_v53  ;;  %v1638_v11 = vsel %vm962_vm9, %v1636_v56, %v1637_v57  ;;  %v1526_v63 = vunpack.c.l.bf16 %v2125_v55 }
  0x83   : >> { %v1480_v3 = vadd.f32 %v1426_v38, %v1356_v1  ;;  %v1020_v13 = vadd.f32 %v967_v7, %v879_v45  ;;  %v1303_v14 = vrot.slane %v1254_v62, 1  ;;  %v1427_v17 = vrot.slane %v1378_v10, 2 }
  0x84   : >> { %v1553_v18 = vmul.f32 %v2667_v34, %v2670_v35  ;;  %v853_v20 = vunpack.c.l.bf16 %v829_v2  ;;  %v1590_v15 = vmul.f32 %v2679_v43, %v1526_v63  ;;  %v1714_v19 = vmul.f32 %v2446_v5, %v1526_v63 }
  0x85   : >> { %v1568_v16 = vadd.f32 %v1552_v42, %v1480_v3  ;;  %v1145_v22 = vadd.f32 %v1092_v9, %v1020_v13  ;;  %v1304_v23 = vsel %vm962_vm9, %v1301_v25, %v1303_v14  ;;  %v1428_v28 = vsel %vm1087_vm10, %v1425_v32, %v1427_v17  ;;  %v831_v14 = vld [vmem:[%s2628_s4 + $0x14] sm:$0x1] }
  0x86   : >> { %v854_v29 = vunpack.c.h.bf16 %v829_v2  ;;  %v880_v30 = vmul.f32 %v2633_v59, %v853_v20  ;;  %v1639_v33 = vrot.slane %v1590_v15, 1  ;;  %v1763_v36 = vrot.slane %v1714_v19, 2  ;;  %v2102_v19 = vld [vmem:[%s2628_s4 + $0x20] sm:$0x1] }
  0x87   : >> { %v1692_v24 = vadd.f32 %v1638_v11, %v1568_v16  ;;  %v1233_v31 = vadd.f32 %v1217_v54, %v1145_v22  ;;  %v917_v37 = vmul.f32 %v2636_v60, %v853_v20  ;;  %v1042_v25 = vmul.f32 %v2639_v61, %v853_v20 }
  0x88   : >> { %v2708_v39 = vmul.f32 %v2636_v60, %v854_v29  ;;  %v2712_v40 = vmul.f32 %v2639_v61, %v854_v29  ;;  %v1640_v41 = vsel %vm962_vm9, %v1637_v57, %v1639_v33  ;;  %v1764_v42 = vsel %vm1087_vm10, %v1761_v50, %v1763_v36 }
  0x89   : >> { %v1816_v38 = vadd.f32 %v1762_v58, %v1692_v24  ;;  %v1357_v32 = vadd.f32 %v1304_v23, %v1233_v31  ;;  %v968_v44 = vrot.slane %v917_v37, 1  ;;  %v1093_v47 = vrot.slane %v1042_v25, 2 }
  0x8a   : >> { %v969_v46 = vrot.slane %v2708_v39, 1  ;;  %v1094_v48 = vrot.slane %v2712_v40, 2  ;;  %v1218_v49 = vmul.f32 %v2662_v26, %v2642_v0  ;;  %v1255_v27 = vmul.f32 %v2662_v26, %v2648_v8 }
  0x8b   : >> { %v1838_v45 = vadd.f32 %v2454_v6, %v1816_v38  ;;  %v1481_v21 = vadd.f32 %v1428_v28, %v1357_v32  ;;  %v2726_v50 = vmul.f32 %v2667_v34, %v2648_v8  ;;  %v1379_v54 = vmul.f32 %v2662_v26, %v2654_v12 }
  0x8c   : >> { %v970_v52 = vsel %vm962_vm9, %v968_v44, %v969_v46  ;;  %v1095_v53 = vsel %vm1087_vm10, %v1093_v47, %v1094_v48  ;;  %v1305_v57 = vrot.slane %v1255_v27, 1  ;;  %v1380_v2 = vmul.f32 %v2667_v34, %v2654_v12 }
  0x8d   : >> { %v1854_v1 = vmax.f32 %v1838_v45, 0.0  ;;  %v1569_v55 = vadd.f32 %v1553_v18, %v1481_v21  ;;  %v1021_v56 = vadd.f32 %v970_v52, %v880_v30  ;;  %v1306_v58 = vrot.slane %v2726_v50, 1 }
  0x8e   : >> { %v1429_v3 = vrot.slane %v1379_v54, 2  ;;  %v1527_v7 = vunpack.c.l.bf16 %v2126_v51  ;;  %v1528_v13 = vunpack.c.h.bf16 %v2126_v51  ;;  %v1430_v63 = vrot.slane %v1380_v2, 2 }
  0x8f   : >> { %v2172_v62 = vpack.c.bf16 %v1854_v1, %v1854_v1  ;;  %v1693_v9 = vadd.f32 %v1640_v41, %v1569_v55  ;;  %v1146_v10 = vadd.f32 %v1095_v53, %v1021_v56  ;;  %v1307_v11 = vsel %vm962_vm9, %v1305_v57, %v1306_v58  ;;  %v2128_v41 = vld [vmem:[%s2628_s4 + $0x2c] sm:$0x1] }
  0x90   : >> { %v1554_v16 = vmul.f32 %v2670_v35, %v1527_v7  ;;  %v1591_v17 = vmul.f32 %v2679_v43, %v1527_v7  ;;  %v1715_v18 = vmul.f32 %v2446_v5, %v1527_v7  ;;  %v1592_v23 = vmul.f32 %v2679_v43, %v1528_v13 }
  0x91   : >> { %1937 = vst.msk [vmem:[%s2734_s6] sm:$0xf] %vm234_vm2, %v2172_v62  ;;  %v1817_v20 = vadd.f32 %v1764_v42, %v1693_v9  ;;  %v1234_v22 = vadd.f32 %v1218_v49, %v1146_v10  ;;  %v1716_v15 = vmul.f32 %v2446_v5, %v1528_v13  ;;  %v1431_v24 = vsel %vm1087_vm10, %v1429_v3, %v1430_v63 }
  0x92   : >> { %v1641_v28 = vrot.slane %v1591_v17, 1  ;;  %v1765_v30 = vrot.slane %v1715_v18, 2  ;;  %v855_v31 = vunpack.c.l.bf16 %v831_v14  ;;  %v1642_v37 = vrot.slane %v1592_v23, 1 }
  0x93   : >> { %v1839_v33 = vadd.f32 %v2454_v6, %v1817_v20  ;;  %v1358_v36 = vadd.f32 %v1307_v11, %v1234_v22  ;;  %v1766_v38 = vrot.slane %v1716_v15, 2  ;;  %v881_v39 = vmul.f32 %v2633_v59, %v854_v29 }
  0x94   : >> { %v919_v25 = vmul.f32 %v2636_v60, %v855_v31  ;;  %v1044_v40 = vmul.f32 %v2639_v61, %v855_v31  ;;  %v1193_v32 = vunpack.c.l.bf16 %v2102_v19  ;;  %v1643_v45 = vsel %vm962_vm9, %v1641_v28, %v1642_v37 }
  0x95   : >> { %v1855_v42 = vmax.f32 %v1839_v33, 0.0  ;;  %v1482_v44 = vadd.f32 %v1431_v24, %v1358_v36  ;;  %v1767_v47 = vsel %vm1087_vm10, %v1765_v30, %v1766_v38  ;;  %v1219_v27 = vmul.f32 %v2667_v34, %v2642_v0 }
  0x96   : >> { %v971_v21 = vrot.slane %v919_v25, 1  ;;  %v1096_v49 = vrot.slane %v1044_v40, 2  ;;  %v1257_v29 = vmul.f32 %v2648_v8, %v1193_v32  ;;  %v1381_v1 = vmul.f32 %v2654_v12, %v1193_v32 }
  0x97   : >> { %v2173_v50 = vpack.c.bf16 %v1855_v42, %v1855_v42  ;;  %v1570_v51 = vadd.f32 %v1554_v16, %v1482_v44  ;;  %v1529_v52 = vunpack.c.l.bf16 %v2128_v41  ;;  %v1555_v56 = vmul.f32 %v2670_v35, %v1528_v13  ;;  %v2103_v16 = vld [vmem:[%s2628_s4 + $0x24] sm:$0xff]  }
  0x98   : >> { %v972_v53 = vsel %vm962_vm9, %v969_v46, %v971_v21  ;;  %v1097_v54 = vsel %vm1087_vm10, %v1094_v48, %v1096_v49  ;;  %v1308_v55 = vrot.slane %v1257_v29, 1  ;;  %v1432_v2 = vrot.slane %v1381_v1, 2 }
  0x99   : >> { %1938 = vst.msk [vmem:[%s2734_s6 + $0x4] sm:$0xf] %vm234_vm2, %v2173_v50  ;;  %v1694_v57 = vadd.f32 %v1643_v45, %v1570_v51  ;;  %v1022_v62 = vadd.f32 %v972_v53, %v881_v39  ;;  %v1593_v3 = vmul.f32 %v2679_v43, %v1529_v52  ;;  %v1717_v9 = vmul.f32 %v2446_v5, %v1529_v52  ;;  %v834_v45 = vld [vmem:[%s2628_s4 + $0x20] sm:$0x1] }
  0x9a   : >> { %v1309_v7 = vsel %vm962_vm9, %v1306_v58, %v1308_v55  ;;  %v882_v46 = vmul.f32 %v2662_v26, %v2633_v59  ;;  %v920_v48 = vmul.f32 %v2662_v26, %v2636_v60  ;;  %v1433_v13 = vsel %vm1087_vm10, %v1430_v63, %v1432_v2 }
  0x9b   : >> { %v1818_v10 = vadd.f32 %v1767_v47, %v1694_v57  ;;  %v1147_v11 = vadd.f32 %v1097_v54, %v1022_v62  ;;  %v1644_v14 = vrot.slane %v1593_v3, 1  ;;  %v1768_v17 = vrot.slane %v1717_v9, 2 }
  0x9c   : >> { %v2777_v18 = vmul.f32 %v2667_v34, %v2636_v60  ;;  %v973_v58 = vrot.slane %v920_v48, 1  ;;  %v1045_v20 = vmul.f32 %v2662_v26, %v2639_v61  ;;  %v2785_v63 = vmul.f32 %v2667_v34, %v2639_v61 }
  0x9d   : >> { %v1840_v22 = vadd.f32 %v2454_v6, %v1818_v10  ;;  %v1235_v23 = vadd.f32 %v1219_v27, %v1147_v11  ;;  %v1645_v15 = vsel %vm962_vm9, %v1642_v37, %v1644_v14  ;;  %v1769_v19 = vsel %vm1087_vm10, %v1766_v38, %v1768_v17  ;;  %v2246_v38 = vld [vmem:[%s2628_s4 + $0x30] sm:$0xff]  }
  0x9e   : >> { %v974_v24 = vrot.slane %v2777_v18, 1  ;;  %v1098_v28 = vrot.slane %v1045_v20, 2  ;;  %v1194_v30 = vunpack.c.l.bf16 %v2103_v16  ;;  %v1099_v26 = vrot.slane %v2785_v63, 2 }
  0x9f   : >> { %v1856_v31 = vmax.f32 %v1840_v22, 0.0  ;;  %v1359_v33 = vadd.f32 %v1309_v7, %v1235_v23  ;;  %v1195_v36 = vunpack.c.h.bf16 %v2103_v16  ;;  %v2801_v51 = vunpack.c.l.bf16 %v2246_v38 }
  0xa0   : >> { %v975_v39 = vsel %vm962_vm9, %v973_v58, %v974_v24  ;;  %v1220_v37 = vmul.f32 %v2642_v0, %v1194_v30  ;;  %v1258_v25 = vmul.f32 %v2648_v8, %v1194_v30  ;;  %v1382_v40 = vmul.f32 %v2654_v12, %v1194_v30 }
  0xa1   : >> { %v2174_v32 = vpack.c.bf16 %v1856_v31, %v1856_v31  ;;  %v1483_v41 = vadd.f32 %v1433_v13, %v1359_v33  ;;  %v1023_v42 = vadd.f32 %v975_v39, %v882_v46  ;;  %v1100_v44 = vsel %vm1087_vm10, %v1098_v28, %v1099_v26 }
  0xa2   : >> { %v1259_v47 = vmul.f32 %v2648_v8, %v1195_v36  ;;  %v1310_v21 = vrot.slane %v1258_v25, 1  ;;  %v1383_v49 = vmul.f32 %v2654_v12, %v1195_v36  ;;  %v1434_v27 = vrot.slane %v1382_v40, 2 }
  0xa3   : >> { %1939 = vst.msk [vmem:[%s2734_s6 + $0x8] sm:$0xf] %vm234_vm2, %v2174_v32  ;;  %v1571_v29 = vadd.f32 %v1555_v56, %v1483_v41  ;;  %v1148_v50 = vadd.f32 %v1100_v44, %v1023_v42  ;;  %v2803_v1 = vunpack.c.h.bf16 %v2246_v38  ;;  %v858_v54 = vunpack.c.l.bf16 %v834_v45  ;;  %v835_v41 = vld [vmem:[%s2628_s4 + $0x24] sm:$0xff]  }
  0xa4   : >> { %v1311_v52 = vrot.slane %v1259_v47, 1  ;;  %v1435_v53 = vrot.slane %v1383_v49, 2  ;;  %v883_v55 = vmul.f32 %v2667_v34, %v2633_v59  ;;  %v1556_v2 = vmul.f32 %v2801_v51, %v2670_v35  ;;  %v2105_v34 = vld [vmem:[%s2628_s4 + $0x2c] sm:$0x1] }
  0xa5   : >> { %v1695_v57 = vadd.f32 %v1645_v15, %v1571_v29  ;;  %v1236_v62 = vadd.f32 %v1220_v37, %v1148_v50  ;;  %v1594_v56 = vmul.f32 %v2801_v51, %v2679_v43  ;;  %v1595_v9 = vmul.f32 %v2803_v1, %v2679_v43  ;;  %v2131_v15 = vld [vmem:[%s2628_s4 + $0x38] sm:$0x1] }
  0xa6   : >> { %v1312_v3 = vsel %vm962_vm9, %v1310_v21, %v1311_v52  ;;  %v1436_v7 = vsel %vm1087_vm10, %v1434_v27, %v1435_v53  ;;  %v1718_v46 = vmul.f32 %v2801_v51, %v2446_v5  ;;  %v1719_v13 = vmul.f32 %v2803_v1, %v2446_v5 }
  0xa7   : >> { %v1819_v48 = vadd.f32 %v1769_v19, %v1695_v57  ;;  %v1360_v10 = vadd.f32 %v1312_v3, %v1236_v62  ;;  %v1646_v11 = vrot.slane %v1594_v56, 1  ;;  %v1647_v14 = vrot.slane %v1595_v9, 1 }
  0xa8   : >> { %v1770_v16 = vrot.slane %v1718_v46, 2  ;;  %v922_v17 = vmul.f32 %v2636_v60, %v858_v54  ;;  %v1047_v18 = vmul.f32 %v2639_v61, %v858_v54  ;;  %v1771_v22 = vrot.slane %v1719_v13, 2 }
  0xa9   : >> { %v1841_v58 = vadd.f32 %v2454_v6, %v1819_v48  ;;  %v1484_v20 = vadd.f32 %v1436_v7, %v1360_v10  ;;  %v1196_v23 = vunpack.c.l.bf16 %v2105_v34  ;;  %v1648_v63 = vsel %vm962_vm9, %v1646_v11, %v1647_v14 }
  0xaa   : >> { %v976_v19 = vrot.slane %v922_v17, 1  ;;  %v1101_v28 = vrot.slane %v1047_v18, 2  ;;  %v1221_v30 = vmul.f32 %v2642_v0, %v1195_v36  ;;  %v1772_v39 = vsel %vm1087_vm10, %v1770_v16, %v1771_v22 }
  0xab   : >> { %v1857_v31 = vmax.f32 %v1841_v58, 0.0  ;;  %v1572_v33 = vadd.f32 %v1556_v2, %v1484_v20  ;;  %v1260_v37 = vmul.f32 %v2648_v8, %v1196_v23  ;;  %v1384_v38 = vmul.f32 %v2654_v12, %v1196_v23  ;;  %v2132_v23 = vld [vmem:[%s2628_s4 + $0x3c] sm:$0xff]  }
  0xac   : >> { %v977_v25 = vsel %vm962_vm9, %v974_v24, %v976_v19  ;;  %v1102_v40 = vsel %vm1087_vm10, %v1099_v26, %v1101_v28  ;;  %v1532_v32 = vunpack.c.l.bf16 %v2131_v15  ;;  %v1557_v21 = vmul.f32 %v2803_v1, %v2670_v35 }
  0xad   : >> { %v2175_v42 = vpack.c.bf16 %v1857_v31, %v1857_v31  ;;  %v1696_v44 = vadd.f32 %v1648_v63, %v1572_v33  ;;  %v1024_v45 = vadd.f32 %v977_v25, %v883_v55  ;;  %v1313_v47 = vrot.slane %v1260_v37, 1 }
  0xae   : >> { %v1437_v36 = vrot.slane %v1384_v38, 2  ;;  %v1596_v49 = vmul.f32 %v2679_v43, %v1532_v32  ;;  %v1720_v27 = vmul.f32 %v2446_v5, %v1532_v32  ;;  %v859_v50 = vunpack.c.l.bf16 %v835_v41 }
  0xaf   : >> { %1940 = vst.msk [vmem:[%s2734_s6 + $0xc] sm:$0xf] %vm234_vm2, %v2175_v42  ;;  %v1820_v24 = vadd.f32 %v1772_v39, %v1696_v44  ;;  %v1149_v26 = vadd.f32 %v1102_v40, %v1024_v45  ;;  %v1314_v29 = vsel %vm962_vm9, %v1311_v52, %v1313_v47  ;;  %v860_v62 = vunpack.c.h.bf16 %v835_v41 }
  0xb0   : >> { %v1438_v54 = vsel %vm1087_vm10, %v1435_v53, %v1437_v36  ;;  %v1649_v57 = vrot.slane %v1596_v49, 1  ;;  %v1773_v55 = vrot.slane %v1720_v27, 2  ;;  %v884_v3 = vmul.f32 %v2633_v59, %v859_v50 }
  0xb1   : >> { %v1842_v2 = vadd.f32 %v2454_v6, %v1820_v24  ;;  %v1237_v56 = vadd.f32 %v1221_v30, %v1149_v26  ;;  %v923_v7 = vmul.f32 %v2636_v60, %v859_v50  ;;  %v924_v52 = vmul.f32 %v2636_v60, %v860_v62  ;;  %v837_v30 = vld [vmem:[%s2628_s4 + $0x2c] sm:$0x1] }
  0xb2   : >> { %v1650_v9 = vsel %vm962_vm9, %v1647_v14, %v1649_v57  ;;  %v1774_v46 = vsel %vm1087_vm10, %v1771_v22, %v1773_v55  ;;  %v1048_v34 = vmul.f32 %v2639_v61, %v859_v50  ;;  %v2848_v11 = vmul.f32 %v2639_v61, %v860_v62  ;;  %v2108_v50 = vld [vmem:[%s2628_s4 + $0x38] sm:$0x1] }
  0xb3   : >> { %v1858_v53 = vmax.f32 %v1842_v2, 0.0  ;;  %v1361_v48 = vadd.f32 %v1314_v29, %v1237_v56  ;;  %v978_v10 = vrot.slane %v923_v7, 1  ;;  %v979_v13 = vrot.slane %v924_v52, 1 }
  0xb4   : >> { %v1103_v16 = vrot.slane %v1048_v34, 2  ;;  %v1222_v14 = vmul.f32 %v2801_v51, %v2642_v0  ;;  %v1261_v17 = vmul.f32 %v2801_v51, %v2648_v8  ;;  %v1104_v20 = vrot.slane %v2848_v11, 2 }
  0xb5   : >> { %v2176_v18 = vpack.c.bf16 %v1858_v53, %v1858_v53  ;;  %v1485_v58 = vadd.f32 %v1438_v54, %v1361_v48  ;;  %v2857_v22 = vmul.f32 %v2803_v1, %v2648_v8  ;;  %v980_v15 = vsel %vm962_vm9, %v978_v10, %v979_v13  ;;  %v2134_v48 = vld [vmem:[%s2628_s4 + $0x44] sm:$0x1] }
  0xb6   : >> { %v1315_v63 = vrot.slane %v1261_v17, 1  ;;  %v1385_v19 = vmul.f32 %v2801_v51, %v2654_v12  ;;  %v1386_v28 = vmul.f32 %v2803_v1, %v2654_v12  ;;  %v1025_v33 = vadd.f32 %v980_v15, %v884_v3 }
  0xb7   : >> { %1941 = vst.msk [vmem:[%s2734_s6 + $0x10] sm:$0xf] %vm234_vm2, %v2176_v18  ;;  %v1573_v31 = vadd.f32 %v1557_v21, %v1485_v58  ;;  %v1105_v39 = vsel %vm1087_vm10, %v1103_v16, %v1104_v20  ;;  %v1316_v37 = vrot.slane %v2857_v22, 1  ;;  %v1533_v38 = vunpack.c.l.bf16 %v2132_v23 }
  0xb8   : >> { %v1439_v25 = vrot.slane %v1385_v19, 2  ;;  %v1440_v40 = vrot.slane %v1386_v28, 2  ;;  %v1534_v32 = vunpack.c.h.bf16 %v2132_v23  ;;  %v1150_v42 = vadd.f32 %v1105_v39, %v1025_v33 }
  0xb9   : >> { %v1697_v41 = vadd.f32 %v1650_v9, %v1573_v31  ;;  %v1317_v44 = vsel %vm962_vm9, %v1315_v63, %v1316_v37  ;;  %v861_v45 = vunpack.c.l.bf16 %v837_v30  ;;  %v1558_v36 = vmul.f32 %v2670_v35, %v1533_v38 }
  0xba   : >> { %v1441_v47 = vsel %vm1087_vm10, %v1439_v25, %v1440_v40  ;;  %v1597_v21 = vmul.f32 %v2679_v43, %v1533_v38  ;;  %v1598_v49 = vmul.f32 %v2679_v43, %v1534_v32  ;;  %v1238_v24 = vadd.f32 %v1222_v14, %v1150_v42 }
  0xbb   : >> { %v1821_v27 = vadd.f32 %v1774_v46, %v1697_v41  ;;  %v1721_v26 = vmul.f32 %v2446_v5, %v1533_v38  ;;  %v1722_v29 = vmul.f32 %v2446_v5, %v1534_v32  ;;  %v885_v55 = vmul.f32 %v2633_v59, %v860_v62 }
  0xbc   : >> { %v1651_v54 = vrot.slane %v1597_v21, 1  ;;  %v1652_v57 = vrot.slane %v1598_v49, 1  ;;  %v925_v2 = vmul.f32 %v2636_v60, %v861_v45  ;;  %v1362_v3 = vadd.f32 %v1317_v44, %v1238_v24 }
  0xbd   : >> { %v1843_v56 = vadd.f32 %v2454_v6, %v1821_v27  ;;  %v1775_v7 = vrot.slane %v1721_v26, 2  ;;  %v1776_v9 = vrot.slane %v1722_v29, 2  ;;  %v1050_v34 = vmul.f32 %v2639_v61, %v861_v45  ;;  %v2247_v27 = vld [vmem:[%s2628_s4 + $0x48] sm:$0xff]  }
  0xbe   : >> { %v1653_v46 = vsel %vm962_vm9, %v1651_v54, %v1652_v57  ;;  %v981_v52 = vrot.slane %v925_v2, 1  ;;  %v1199_v53 = vunpack.c.l.bf16 %v2108_v50  ;;  %v1486_v11 = vadd.f32 %v1441_v47, %v1362_v3 }
  0xbf   : >> { %v1859_v10 = vmax.f32 %v1843_v56, 0.0  ;;  %v1777_v16 = vsel %vm1087_vm10, %v1775_v7, %v1776_v9  ;;  %v1223_v62 = vmul.f32 %v2803_v1, %v2642_v0  ;;  %v1106_v17 = vrot.slane %v1050_v34, 2 }
  0xc0   : >> { %v982_v14 = vsel %vm962_vm9, %v979_v13, %v981_v52  ;;  %v1263_v18 = vmul.f32 %v2648_v8, %v1199_v53  ;;  %v1387_v58 = vmul.f32 %v2654_v12, %v1199_v53  ;;  %v1574_v23 = vadd.f32 %v1558_v36, %v1486_v11  ;;  %v2109_v36 = vld [vmem:[%s2628_s4 + $0x3c] sm:$0xff]  }
  0xc1   : >> { %v2177_v22 = vpack.c.bf16 %v1859_v10, %v1859_v10  ;;  %v1026_v15 = vadd.f32 %v982_v14, %v885_v55  ;;  %v1535_v63 = vunpack.c.l.bf16 %v2134_v48  ;;  %v1107_v19 = vsel %vm1087_vm10, %v1104_v20, %v1106_v17 }
  0xc2   : >> { %v1318_v28 = vrot.slane %v1263_v18, 1  ;;  %v1442_v30 = vrot.slane %v1387_v58, 2  ;;  %v1559_v31 = vmul.f32 %v2670_v35, %v1534_v32  ;;  %v1698_v33 = vadd.f32 %v1653_v46, %v1574_v23 }
  0xc3   : >> { %1942 = vst.msk [vmem:[%s2734_s6 + $0x14] sm:$0xf] %vm234_vm2, %v2177_v22  ;;  %v1151_v13 = vadd.f32 %v1107_v19, %v1026_v15  ;;  %v1599_v39 = vmul.f32 %v2679_v43, %v1535_v63  ;;  %v1723_v25 = vmul.f32 %v2446_v5, %v1535_v63  ;;  %v886_v20 = vmul.f32 %v2801_v51, %v2633_v59 }
  0xc4   : >> { %v1319_v38 = vsel %vm962_vm9, %v1316_v37, %v1318_v28  ;;  %v1443_v41 = vsel %vm1087_vm10, %v1440_v40, %v1442_v30  ;;  %v926_v42 = vmul.f32 %v2801_v51, %v2636_v60  ;;  %v1822_v32 = vadd.f32 %v1777_v16, %v1698_v33  ;;  %v840_v30 = vld [vmem:[%s2628_s4 + $0x38] sm:$0x1] }
  0xc5   : >> { %v1239_v44 = vadd.f32 %v1223_v62, %v1151_v13  ;;  %v1654_v45 = vrot.slane %v1599_v39, 1  ;;  %v1778_v47 = vrot.slane %v1723_v25, 2  ;;  %v2905_v21 = vmul.f32 %v2803_v1, %v2636_v60  ;;  %v2111_v25 = vld [vmem:[%s2628_s4 + $0x44] sm:$0x1] }
  0xc6   : >> { %v983_v49 = vrot.slane %v926_v42, 1  ;;  %v1051_v37 = vmul.f32 %v2801_v51, %v2639_v61  ;;  %v2911_v40 = vmul.f32 %v2803_v1, %v2639_v61  ;;  %v1844_v24 = vadd.f32 %v2454_v6, %v1822_v32 }
  0xc7   : >> { %v1363_v26 = vadd.f32 %v1319_v38, %v1239_v44  ;;  %v1655_v29 = vsel %vm962_vm9, %v1652_v57, %v1654_v45  ;;  %v1779_v50 = vsel %vm1087_vm10, %v1776_v9, %v1778_v47  ;;  %v984_v54 = vrot.slane %v2905_v21, 1 }
  0xc8   : >> { %v1108_v55 = vrot.slane %v1051_v37, 2  ;;  %v1109_v2 = vrot.slane %v2911_v40, 2  ;;  %v1200_v56 = vunpack.c.l.bf16 %v2109_v36  ;;  %v1860_v3 = vmax.f32 %v1844_v24, 0.0 }
  0xc9   : >> { %v1487_v51 = vadd.f32 %v1443_v41, %v1363_v26  ;;  %v1201_v7 = vunpack.c.h.bf16 %v2109_v36  ;;  %v2919_v46 = vunpack.c.l.bf16 %v2247_v27  ;;  %v985_v52 = vsel %vm962_vm9, %v983_v49, %v984_v54 }
  0xca   : >> { %v1110_v57 = vsel %vm1087_vm10, %v1108_v55, %v1109_v2  ;;  %v1224_v9 = vmul.f32 %v2642_v0, %v1200_v56  ;;  %v1264_v34 = vmul.f32 %v2648_v8, %v1200_v56  ;;  %v2178_v53 = vpack.c.bf16 %v1860_v3, %v1860_v3  ;;  %v2137_v55 = vld [vmem:[%s2628_s4 + $0x50] sm:$0x1] }
  0xcb   : >> { %v1575_v48 = vadd.f32 %v1559_v31, %v1487_v51  ;;  %v1027_v10 = vadd.f32 %v985_v52, %v886_v20  ;;  %v1265_v11 = vmul.f32 %v2648_v8, %v1201_v7  ;;  %v1388_v62 = vmul.f32 %v2654_v12, %v1200_v56 }
  0xcc   : >> { %v1320_v16 = vrot.slane %v1264_v34, 1  ;;  %v1389_v14 = vmul.f32 %v2654_v12, %v1201_v7  ;;  %v2932_v17 = vunpack.c.h.bf16 %v2247_v27  ;;  %1943 = vst.msk [vmem:[%s2734_s6 + $0x18] sm:$0xf] %vm234_vm2, %v2178_v53  ;;  %v1560_v23 = vmul.f32 %v2919_v46, %v2670_v35 }
  0xcd   : >> { %v1699_v18 = vadd.f32 %v1655_v29, %v1575_v48  ;;  %v1152_v58 = vadd.f32 %v1110_v57, %v1027_v10  ;;  %v1321_v22 = vrot.slane %v1265_v11, 1  ;;  %v1444_v15 = vrot.slane %v1388_v62, 2  ;;  %v841_v57 = vld [vmem:[%s2628_s4 + $0x3c] sm:$0xff]  }
  0xce   : >> { %v1445_v63 = vrot.slane %v1389_v14, 2  ;;  %v1600_v19 = vmul.f32 %v2919_v46, %v2679_v43  ;;  %v1601_v28 = vmul.f32 %v2932_v17, %v2679_v43  ;;  %v1724_v39 = vmul.f32 %v2919_v46, %v2446_v5 }
  0xcf   : >> { %v1823_v31 = vadd.f32 %v1779_v50, %v1699_v18  ;;  %v1240_v33 = vadd.f32 %v1224_v9, %v1152_v58  ;;  %v1322_v13 = vsel %vm962_vm9, %v1320_v16, %v1321_v22  ;;  %v1725_v42 = vmul.f32 %v2932_v17, %v2446_v5 }
  0xd0   : >> { %v1446_v38 = vsel %vm1087_vm10, %v1444_v15, %v1445_v63  ;;  %v1656_v41 = vrot.slane %v1600_v19, 1  ;;  %v1657_v20 = vrot.slane %v1601_v28, 1  ;;  %v1780_v45 = vrot.slane %v1724_v39, 2 }
  0xd1   : >> { %v1845_v32 = vadd.f32 %v2454_v6, %v1823_v31  ;;  %v1364_v44 = vadd.f32 %v1322_v13, %v1240_v33  ;;  %v864_v47 = vunpack.c.l.bf16 %v840_v30  ;;  %v1781_v49 = vrot.slane %v1725_v42, 2 }
  0xd2   : >> { %v1658_v36 = vsel %vm962_vm9, %v1656_v41, %v1657_v20  ;;  %v887_v37 = vmul.f32 %v2803_v1, %v2633_v59  ;;  %v1202_v27 = vunpack.c.l.bf16 %v2111_v25  ;;  %v1225_v3 = vmul.f32 %v2642_v0, %v1201_v7 }
  0xd3   : >> { %v1861_v24 = vmax.f32 %v1845_v32, 0.0  ;;  %v1488_v26 = vadd.f32 %v1446_v38, %v1364_v44  ;;  %v928_v29 = vmul.f32 %v2636_v60, %v864_v47  ;;  %v1053_v50 = vmul.f32 %v2639_v61, %v864_v47 }
  0xd4   : >> { %v1782_v56 = vsel %vm1087_vm10, %v1780_v45, %v1781_v49  ;;  %v1266_v51 = vmul.f32 %v2648_v8, %v1202_v27  ;;  %v1390_v52 = vmul.f32 %v2654_v12, %v1202_v27  ;;  %v1538_v11 = vunpack.c.l.bf16 %v2137_v55  ;;  %v843_v55 = vld [vmem:[%s2628_s4 + $0x44] sm:$0x1] }
  0xd5   : >> { %v2179_v9 = vpack.c.bf16 %v1861_v24, %v1861_v24  ;;  %v1576_v1 = vadd.f32 %v1560_v23, %v1488_v26  ;;  %v986_v34 = vrot.slane %v928_v29, 1  ;;  %v1111_v53 = vrot.slane %v1053_v50, 2  ;;  %v2138_v24 = vld [vmem:[%s2628_s4 + $0x54] sm:$0xff]  }
  0xd6   : >> { %v1323_v48 = vrot.slane %v1266_v51, 1  ;;  %v1447_v10 = vrot.slane %v1390_v52, 2  ;;  %v1561_v16 = vmul.f32 %v2932_v17, %v2670_v35  ;;  %v865_v18 = vunpack.c.l.bf16 %v841_v57 }
  0xd7   : >> { %1944 = vst.msk [vmem:[%s2734_s6 + $0x1c] sm:$0xf] %vm234_vm2, %v2179_v9  ;;  %v1700_v62 = vadd.f32 %v1658_v36, %v1576_v1  ;;  %v987_v7 = vsel %vm962_vm9, %v984_v54, %v986_v34  ;;  %v1112_v14 = vsel %vm1087_vm10, %v1109_v2, %v1111_v53  ;;  %v1602_v19 = vmul.f32 %v2679_v43, %v1538_v11 }
  0xd8   : >> { %v1028_v58 = vadd.f32 %v987_v7, %v887_v37  ;;  %v1324_v23 = vsel %vm962_vm9, %v1321_v22, %v1323_v48  ;;  %v1448_v15 = vsel %vm1087_vm10, %v1445_v63, %v1447_v10  ;;  %v1726_v30 = vmul.f32 %v2446_v5, %v1538_v11 }
  0xd9   : >> { %v1824_v28 = vadd.f32 %v1782_v56, %v1700_v62  ;;  %v866_v31 = vunpack.c.h.bf16 %v841_v57  ;;  %v888_v21 = vmul.f32 %v2633_v59, %v865_v18  ;;  %v1659_v54 = vrot.slane %v1602_v19, 1 }
  0xda   : >> { %v1153_v33 = vadd.f32 %v1112_v14, %v1028_v58  ;;  %v929_v40 = vmul.f32 %v2636_v60, %v865_v18  ;;  %v1054_v2 = vmul.f32 %v2639_v61, %v865_v18  ;;  %v1783_v22 = vrot.slane %v1726_v30, 2 }
  0xdb   : >> { %v1846_v13 = vadd.f32 %v2454_v6, %v1824_v28  ;;  %v2981_v63 = vmul.f32 %v2636_v60, %v866_v31  ;;  %v2984_v39 = vmul.f32 %v2639_v61, %v866_v31  ;;  %v1660_v38 = vsel %vm962_vm9, %v1657_v20, %v1659_v54  ;;  %v2114_v28 = vld [vmem:[%s2628_s4 + $0x50] sm:$0x1] }
  0xdc   : >> { %v1241_v25 = vadd.f32 %v1225_v3, %v1153_v33  ;;  %v988_v41 = vrot.slane %v929_v40, 1  ;;  %v1113_v42 = vrot.slane %v1054_v2, 2  ;;  %v1784_v44 = vsel %vm1087_vm10, %v1781_v49, %v1783_v22 }
  0xdd   : >> { %v1862_v32 = vmax.f32 %v1846_v13, 0.0  ;;  %v989_v45 = vrot.slane %v2981_v63, 1  ;;  %v1114_v47 = vrot.slane %v2984_v39, 2  ;;  %v1226_v37 = vmul.f32 %v2919_v46, %v2642_v0 }
  0xde   : >> { %v1365_v36 = vadd.f32 %v1324_v23, %v1241_v25  ;;  %v1267_v27 = vmul.f32 %v2919_v46, %v2648_v8  ;;  %v2996_v20 = vmul.f32 %v2932_v17, %v2648_v8  ;;  %v1391_v50 = vmul.f32 %v2919_v46, %v2654_v12 }
  0xdf   : >> { %v2180_v26 = vpack.c.bf16 %v1862_v32, %v1862_v32  ;;  %v990_v49 = vsel %vm962_vm9, %v988_v41, %v989_v45  ;;  %v1115_v29 = vsel %vm1087_vm10, %v1113_v42, %v1114_v47  ;;  %v1392_v57 = vmul.f32 %v2932_v17, %v2654_v12 }
  0xe0   : >> { %v1489_v56 = vadd.f32 %v1448_v15, %v1365_v36  ;;  %v1029_v3 = vadd.f32 %v990_v49, %v888_v21  ;;  %v1325_v51 = vrot.slane %v1267_v27, 1  ;;  %v1326_v52 = vrot.slane %v2996_v20, 1 }
  0xe1   : >> { %1945 = vst.msk [vmem:[%s2734_s6 + $0x20] sm:$0xf] %vm234_vm2, %v2180_v26  ;;  %v1449_v9 = vrot.slane %v1391_v50, 2  ;;  %v1539_v1 = vunpack.c.l.bf16 %v2138_v24  ;;  %v1540_v34 = vunpack.c.h.bf16 %v2138_v24  ;;  %v867_v11 = vunpack.c.l.bf16 %v843_v55 }
  0xe2   : >> { %v1577_v53 = vadd.f32 %v1561_v16, %v1489_v56  ;;  %v1154_v48 = vadd.f32 %v1115_v29, %v1029_v3  ;;  %v1327_v10 = vsel %vm962_vm9, %v1325_v51, %v1326_v52  ;;  %v1450_v62 = vrot.slane %v1392_v57, 2 }
  0xe3   : >> { %v1562_v7 = vmul.f32 %v2670_v35, %v1539_v1  ;;  %v1603_v14 = vmul.f32 %v2679_v43, %v1539_v1  ;;  %v1604_v18 = vmul.f32 %v2679_v43, %v1540_v34  ;;  %v1727_v15 = vmul.f32 %v2446_v5, %v1539_v1 }
  0xe4   : >> { %v1701_v58 = vadd.f32 %v1660_v38, %v1577_v53  ;;  %v1242_v23 = vadd.f32 %v1226_v37, %v1154_v48  ;;  %v1728_v19 = vmul.f32 %v2446_v5, %v1540_v34  ;;  %v1451_v16 = vsel %vm1087_vm10, %v1449_v9, %v1450_v62  ;;  %v2140_v38 = vld [vmem:[%s2628_s4 + $0x5c] sm:$0x1] }
  0xe5   : >> { %v1661_v30 = vrot.slane %v1603_v14, 1  ;;  %v1662_v21 = vrot.slane %v1604_v18, 1  ;;  %v889_v33 = vmul.f32 %v2633_v59, %v866_v31  ;;  %v1785_v2 = vrot.slane %v1727_v15, 2  ;;  %v2115_v18 = vld [vmem:[%s2628_s4 + $0x54] sm:$0xff]  }
  0xe6   : >> { %v1825_v54 = vadd.f32 %v1784_v44, %v1701_v58  ;;  %v1366_v40 = vadd.f32 %v1327_v10, %v1242_v23  ;;  %v1786_v13 = vrot.slane %v1728_v19, 2  ;;  %v931_v63 = vmul.f32 %v2636_v60, %v867_v11 }
  0xe7   : >> { %v1663_v22 = vsel %vm962_vm9, %v1661_v30, %v1662_v21  ;;  %v1056_v39 = vmul.f32 %v2639_v61, %v867_v11  ;;  %v1205_v25 = vunpack.c.l.bf16 %v2114_v28  ;;  %v1227_v31 = vmul.f32 %v2932_v17, %v2642_v0  ;;  %v2248_v28 = vld [vmem:[%s2628_s4 + $0x60] sm:$0xff]  }
  0xe8   : >> { %v1847_v41 = vadd.f32 %v2454_v6, %v1825_v54  ;;  %v1490_v42 = vadd.f32 %v1451_v16, %v1366_v40  ;;  %v1787_v32 = vsel %vm1087_vm10, %v1785_v2, %v1786_v13  ;;  %v991_v44 = vrot.slane %v931_v63, 1 }
  0xe9   : >> { %v1116_v36 = vrot.slane %v1056_v39, 2  ;;  %v1269_v37 = vmul.f32 %v2648_v8, %v1205_v25  ;;  %v1393_v27 = vmul.f32 %v2654_v12, %v1205_v25  ;;  %v1541_v26 = vunpack.c.l.bf16 %v2140_v38 }
  0xea   : >> { %v1863_v20 = vmax.f32 %v1847_v41, 0.0  ;;  %v1578_v24 = vadd.f32 %v1562_v7, %v1490_v42  ;;  %v1563_v49 = vmul.f32 %v2670_v35, %v1540_v34  ;;  %v992_v29 = vsel %vm962_vm9, %v989_v45, %v991_v44 }
  0xeb   : >> { %v1117_v50 = vsel %vm1087_vm10, %v1114_v47, %v1116_v36  ;;  %v1328_v55 = vrot.slane %v1269_v37, 1  ;;  %v1452_v56 = vrot.slane %v1393_v27, 2  ;;  %v1030_v57 = vadd.f32 %v992_v29, %v889_v33 }
  0xec   : >> { %v2181_v3 = vpack.c.bf16 %v1863_v20, %v1863_v20  ;;  %v1702_v51 = vadd.f32 %v1663_v22, %v1578_v24  ;;  %v1605_v9 = vmul.f32 %v2679_v43, %v1541_v26  ;;  %v1729_v48 = vmul.f32 %v2446_v5, %v1541_v26 }
  0xed   : >> { %v1329_v1 = vsel %vm962_vm9, %v1326_v52, %v1328_v55  ;;  %v1453_v53 = vsel %vm1087_vm10, %v1450_v62, %v1452_v56  ;;  %v890_v45 = vmul.f32 %v2919_v46, %v2633_v59  ;;  %v1155_v34 = vadd.f32 %v1117_v50, %v1030_v57  ;;  %v846_v56 = vld [vmem:[%s2628_s4 + $0x50] sm:$0x1] }
  0xee   : >> { %1946 = vst.msk [vmem:[%s2734_s6 + $0x24] sm:$0xf] %vm234_vm2, %v2181_v3  ;;  %v1826_v47 = vadd.f32 %v1787_v32, %v1702_v51  ;;  %v1664_v10 = vrot.slane %v1605_v9, 1  ;;  %v932_v11 = vmul.f32 %v2919_v46, %v2636_v60  ;;  %v1788_v7 = vrot.slane %v1729_v48, 2 }
  0xef   : >> { %v3043_v52 = vmul.f32 %v2932_v17, %v2636_v60  ;;  %v1057_v62 = vmul.f32 %v2919_v46, %v2639_v61  ;;  %v3049_v14 = vmul.f32 %v2932_v17, %v2639_v61  ;;  %v1243_v23 = vadd.f32 %v1227_v31, %v1155_v34 }
  0xf0   : >> { %v1848_v58 = vadd.f32 %v2454_v6, %v1826_v47  ;;  %v1665_v15 = vsel %vm962_vm9, %v1662_v21, %v1664_v10  ;;  %v993_v19 = vrot.slane %v932_v11, 1  ;;  %v1789_v16 = vsel %vm1087_vm10, %v1786_v13, %v1788_v7 }
  0xf1   : >> { %v994_v30 = vrot.slane %v3043_v52, 1  ;;  %v1118_v33 = vrot.slane %v1057_v62, 2  ;;  %v1119_v54 = vrot.slane %v3049_v14, 2  ;;  %v1367_v40 = vadd.f32 %v1329_v1, %v1243_v23  ;;  %v2117_v1 = vld [vmem:[%s2628_s4 + $0x5c] sm:$0x1] }
  0xf2   : >> { %v1864_v46 = vmax.f32 %v1848_v58, 0.0  ;;  %v1206_v2 = vunpack.c.l.bf16 %v2115_v18  ;;  %v1207_v22 = vunpack.c.h.bf16 %v2115_v18  ;;  %v3064_v39 = vunpack.c.l.bf16 %v2248_v28 }
  0xf3   : >> { %v995_v63 = vsel %vm962_vm9, %v993_v19, %v994_v30  ;;  %v1120_v21 = vsel %vm1087_vm10, %v1118_v33, %v1119_v54  ;;  %v3066_v13 = vunpack.c.h.bf16 %v2248_v28  ;;  %v1491_v38 = vadd.f32 %v1453_v53, %v1367_v40  ;;  %v2143_v33 = vld [vmem:[%s2628_s4 + $0x68] sm:$0x1] }
  0xf4   : >> { %v2182_v25 = vpack.c.bf16 %v1864_v46, %v1864_v46  ;;  %v1031_v41 = vadd.f32 %v995_v63, %v890_v45  ;;  %v1228_v42 = vmul.f32 %v2642_v0, %v1206_v2  ;;  %v1270_v32 = vmul.f32 %v2648_v8, %v1206_v2 }
  0xf5   : >> { %v1271_v31 = vmul.f32 %v2648_v8, %v1207_v22  ;;  %v1394_v44 = vmul.f32 %v2654_v12, %v1206_v2  ;;  %v1395_v36 = vmul.f32 %v2654_v12, %v1207_v22  ;;  %v1579_v37 = vadd.f32 %v1563_v49, %v1491_v38 }
  0xf6   : >> { %1947 = vst.msk [vmem:[%s2734_s6 + $0x28] sm:$0xf] %vm234_vm2, %v2182_v25  ;;  %v1156_v27 = vadd.f32 %v1120_v21, %v1031_v41  ;;  %v1564_v20 = vmul.f32 %v3064_v39, %v2670_v35  ;;  %v1606_v24 = vmul.f32 %v3064_v39, %v2679_v43  ;;  %v1330_v26 = vrot.slane %v1270_v32, 1 }
  0xf7   : >> { %v1331_v29 = vrot.slane %v1271_v31, 1  ;;  %v1454_v50 = vrot.slane %v1394_v44, 2  ;;  %v1455_v55 = vrot.slane %v1395_v36, 2  ;;  %v1703_v3 = vadd.f32 %v1665_v15, %v1579_v37  ;;  %v847_v31 = vld [vmem:[%s2628_s4 + $0x54] sm:$0xff]  }
  0xf8   : >> { %v1244_v51 = vadd.f32 %v1228_v42, %v1156_v27  ;;  %v1607_v57 = vmul.f32 %v3066_v13, %v2679_v43  ;;  %v1666_v9 = vrot.slane %v1606_v24, 1  ;;  %v1730_v48 = vmul.f32 %v3064_v39, %v2446_v5 }
  0xf9   : >> { %v1332_v49 = vsel %vm962_vm9, %v1330_v26, %v1331_v29  ;;  %v1456_v53 = vsel %vm1087_vm10, %v1454_v50, %v1455_v55  ;;  %v1731_v45 = vmul.f32 %v3066_v13, %v2446_v5  ;;  %v1827_v47 = vadd.f32 %v1789_v16, %v1703_v3 }
  0xfa   : >> { %v1368_v34 = vadd.f32 %v1332_v49, %v1244_v51  ;;  %v1667_v10 = vrot.slane %v1607_v57, 1  ;;  %v870_v11 = vunpack.c.l.bf16 %v846_v56  ;;  %v1790_v7 = vrot.slane %v1730_v48, 2 }
  0xfb   : >> { %v1791_v62 = vrot.slane %v1731_v45, 2  ;;  %v891_v18 = vmul.f32 %v2932_v17, %v2633_v59  ;;  %v1208_v58 = vunpack.c.l.bf16 %v2117_v1  ;;  %v1849_v23 = vadd.f32 %v2454_v6, %v1827_v47 }
  0xfc   : >> { %v1492_v15 = vadd.f32 %v1456_v53, %v1368_v34  ;;  %v1668_v19 = vsel %vm962_vm9, %v1666_v9, %v1667_v10  ;;  %v934_v28 = vmul.f32 %v2636_v60, %v870_v11  ;;  %v1059_v46 = vmul.f32 %v2639_v61, %v870_v11 }
  0xfd   : >> { %v1792_v16 = vsel %vm1087_vm10, %v1790_v7, %v1791_v62  ;;  %v1229_v40 = vmul.f32 %v2642_v0, %v1207_v22  ;;  %v1272_v2 = vmul.f32 %v2648_v8, %v1208_v58  ;;  %v1865_v63 = vmax.f32 %v1849_v23, 0.0 }
  0xfe   : >> { %v1580_v17 = vadd.f32 %v1564_v20, %v1492_v15  ;;  %v996_v21 = vrot.slane %v934_v28, 1  ;;  %v1396_v25 = vmul.f32 %v2654_v12, %v1208_v58  ;;  %v1121_v38 = vrot.slane %v1059_v46, 2  ;;  %v2144_v28 = vld [vmem:[%s2628_s4 + $0x6c] sm:$0xff]  }
  0xff   : >> { %v1333_v41 = vrot.slane %v1272_v2, 1  ;;  %v1544_v42 = vunpack.c.l.bf16 %v2143_v33  ;;  %v1565_v32 = vmul.f32 %v3066_v13, %v2670_v35  ;;  %v2183_v44 = vpack.c.bf16 %v1865_v63, %v1865_v63  ;;  %v849_v2 = vld [vmem:[%s2628_s4 + $0x5c] sm:$0x1] }
 0x100   : >> { %v1704_v36 = vadd.f32 %v1668_v19, %v1580_v17  ;;  %v997_v22 = vsel %vm962_vm9, %v994_v30, %v996_v21  ;;  %v1457_v37 = vrot.slane %v1396_v25, 2  ;;  %v1122_v20 = vsel %vm1087_vm10, %v1119_v54, %v1121_v38 }
 0x101   : >> { %v1032_v27 = vadd.f32 %v997_v22, %v891_v18  ;;  %v1334_v24 = vsel %vm962_vm9, %v1331_v29, %v1333_v41  ;;  %v1608_v26 = vmul.f32 %v2679_v43, %v1544_v42  ;;  %1948 = vst.msk [vmem:[%s2734_s6 + $0x2c] sm:$0xf] %vm234_vm2, %v2183_v44  ;;  %v1732_v3 = vmul.f32 %v2446_v5, %v1544_v42 }
 0x102   : >> { %v1828_v50 = vadd.f32 %v1792_v16, %v1704_v36  ;;  %v1458_v56 = vsel %vm1087_vm10, %v1455_v55, %v1457_v37  ;;  %v871_v52 = vunpack.c.l.bf16 %v847_v31  ;;  %v872_v57 = vunpack.c.h.bf16 %v847_v31 }
 0x103   : >> { %v1157_v51 = vadd.f32 %v1122_v20, %v1032_v27  ;;  %v1669_v30 = vrot.slane %v1608_v26, 1  ;;  %v1230_v14 = vmul.f32 %v3064_v39, %v2642_v0  ;;  %v1793_v9 = vrot.slane %v1732_v3, 2  ;;  %v2120_v3 = vld [vmem:[%s2628_s4 + $0x68] sm:$0x1] }
 0x104   : >> { %v1850_v54 = vadd.f32 %v2454_v6, %v1828_v50  ;;  %v892_v29 = vmul.f32 %v2633_v59, %v871_v52  ;;  %v935_v1 = vmul.f32 %v2636_v60, %v871_v52  ;;  %v936_v53 = vmul.f32 %v2636_v60, %v872_v57 }
 0x105   : >> { %v1245_v49 = vadd.f32 %v1229_v40, %v1157_v51  ;;  %v1670_v55 = vsel %vm962_vm9, %v1667_v10, %v1669_v30  ;;  %v1060_v48 = vmul.f32 %v2639_v61, %v871_v52  ;;  %v1794_v47 = vsel %vm1087_vm10, %v1791_v62, %v1793_v9 }
 0x106   : >> { %v1866_v45 = vmax.f32 %v1850_v54, 0.0  ;;  %v998_v34 = vrot.slane %v935_v1, 1  ;;  %v1061_v11 = vmul.f32 %v2639_v61, %v872_v57  ;;  %v999_v18 = vrot.slane %v936_v53, 1  ;;  %v2146_v53 = vld [vmem:[%s2628_s4 + $0x74] sm:$0x1] }
 0x107   : >> { %v1369_v7 = vadd.f32 %v1334_v24, %v1245_v49  ;;  %v1123_v58 = vrot.slane %v1060_v48, 2  ;;  %v1273_v23 = vmul.f32 %v3064_v39, %v2648_v8  ;;  %v3129_v19 = vmul.f32 %v3066_v13, %v2648_v8 }
 0x108   : >> { %v2184_v15 = vpack.c.bf16 %v1866_v45, %v1866_v45  ;;  %v1124_v10 = vrot.slane %v1061_v11, 2  ;;  %v1397_v62 = vmul.f32 %v3064_v39, %v2654_v12  ;;  %v1000_v16 = vsel %vm962_vm9, %v998_v34, %v999_v18 }
 0x109   : >> { %v1493_v33 = vadd.f32 %v1458_v56, %v1369_v7  ;;  %v1335_v46 = vrot.slane %v1273_v23, 1  ;;  %v1398_v40 = vmul.f32 %v3066_v13, %v2654_v12  ;;  %v1033_v63 = vadd.f32 %v1000_v16, %v892_v29 }
 0x10a   : >> { %1949 = vst.msk [vmem:[%s2734_s6 + $0x30] sm:$0xf] %vm234_vm2, %v2184_v15  ;;  %v1125_v17 = vsel %vm1087_vm10, %v1123_v58, %v1124_v10  ;;  %v1336_v21 = vrot.slane %v3129_v19, 1  ;;  %v1459_v25 = vrot.slane %v1397_v62, 2  ;;  %v1545_v41 = vunpack.c.l.bf16 %v2144_v28 }
 0x10b   : >> { %v1581_v38 = vadd.f32 %v1565_v32, %v1493_v33  ;;  %v1460_v39 = vrot.slane %v1398_v40, 2  ;;  %v1546_v42 = vunpack.c.h.bf16 %v2144_v28  ;;  %v1158_v31 = vadd.f32 %v1125_v17, %v1033_v63 }
 0x10c   : >> { %v1337_v44 = vsel %vm962_vm9, %v1335_v46, %v1336_v21  ;;  %v873_v36 = vunpack.c.l.bf16 %v849_v2  ;;  %v893_v22 = vmul.f32 %v2633_v59, %v872_v57  ;;  %v1566_v20 = vmul.f32 %v2670_v35, %v1545_v41 }
 0x10d   : >> { %v1705_v37 = vadd.f32 %v1670_v55, %v1581_v38  ;;  %v1461_v27 = vsel %vm1087_vm10, %v1459_v25, %v1460_v39  ;;  %v1609_v24 = vmul.f32 %v2679_v43, %v1545_v41  ;;  %v1246_v26 = vadd.f32 %v1230_v14, %v1158_v31 }
 0x10e   : >> { %v1610_v32 = vmul.f32 %v2679_v43, %v1546_v42  ;;  %v1733_v50 = vmul.f32 %v2446_v5, %v1545_v41  ;;  %v1734_v56 = vmul.f32 %v2446_v5, %v1546_v42  ;;  %v937_v59 = vmul.f32 %v2636_v60, %v873_v36 }
 0x10f   : >> { %v1829_v52 = vadd.f32 %v1794_v47, %v1705_v37  ;;  %v1671_v51 = vrot.slane %v1609_v24, 1  ;;  %v1062_v30 = vmul.f32 %v2639_v61, %v873_v36  ;;  %v1370_v57 = vadd.f32 %v1337_v44, %v1246_v26 }
 0x110   : >> { %v1672_v54 = vrot.slane %v1610_v32, 1  ;;  %v1795_v9 = vrot.slane %v1733_v50, 2  ;;  %v1796_v29 = vrot.slane %v1734_v56, 2  ;;  %v1001_v1 = vrot.slane %v937_v59, 1 }
 0x111   : >> { %v1851_v14 = vadd.f32 %v2454_v6, %v1829_v52  ;;  %v1126_v49 = vrot.slane %v1062_v30, 2  ;;  %v1211_v55 = vunpack.c.l.bf16 %v2120_v3  ;;  %v1494_v48 = vadd.f32 %v1461_v27, %v1370_v57 }
 0x112   : >> { %v1673_v45 = vsel %vm962_vm9, %v1671_v51, %v1672_v54  ;;  %v1231_v47 = vmul.f32 %v3066_v13, %v2642_v0  ;;  %v1002_v61 = vsel %vm962_vm9, %v999_v18, %v1001_v1  ;;  %v1547_v15 = vunpack.c.l.bf16 %v2146_v53 }
 0x113   : >> { %v1867_v60 = vmax.f32 %v1851_v14, 0.0  ;;  %v1127_v34 = vsel %vm1087_vm10, %v1124_v10, %v1126_v49  ;;  %v1275_v11 = vmul.f32 %v2648_v8, %v1211_v55  ;;  %v1582_v7 = vadd.f32 %v1566_v20, %v1494_v48 }
 0x114   : >> { %v1034_v58 = vadd.f32 %v1002_v61, %v893_v22  ;;  %v1399_v23 = vmul.f32 %v2654_v12, %v1211_v55  ;;  %v1797_v62 = vsel %vm1087_vm10, %v1795_v9, %v1796_v29  ;;  %v1611_v13 = vmul.f32 %v2679_v43, %v1547_v15 }
 0x115   : >> { %v2185_v19 = vpack.c.bf16 %v1867_v60, %v1867_v60  ;;  %v1338_v28 = vrot.slane %v1275_v11, 1  ;;  %v1706_v33 = vadd.f32 %v1673_v45, %v1582_v7  ;;  %v1735_v8 = vmul.f32 %v2446_v5, %v1547_v15 }
 0x116   : >> { %v1159_v16 = vadd.f32 %v1127_v34, %v1034_v58  ;;  %v1462_v0 = vrot.slane %v1399_v23, 2  ;;  %v1674_v40 = vrot.slane %v1611_v13, 1  ;;  %v1567_v17 = vmul.f32 %v2670_v35, %v1546_v42 }
 0x117   : >> { %1950 = vst.msk [vmem:[%s2734_s6 + $0x34] sm:$0xf] %vm234_vm2, %v2185_v19  ;;  %v1339_v18 = vsel %vm962_vm9, %v1336_v21, %v1338_v28  ;;  %v1830_v10 = vadd.f32 %v1797_v62, %v1706_v33  ;;  %v1798_v25 = vrot.slane %v1735_v8, 2 }
 0x118   : >> { %v1247_v46 = vadd.f32 %v1231_v47, %v1159_v16  ;;  %v1463_v12 = vsel %vm1087_vm10, %v1460_v39, %v1462_v0  ;;  %v1675_v41 = vsel %vm962_vm9, %v1672_v54, %v1674_v40 }
 0x119   : >> { %v1852_v2 = vadd.f32 %v2454_v6, %v1830_v10  ;;  %v1799_v44 = vsel %vm1087_vm10, %v1796_v29, %v1798_v25 }
 0x11a   : >> { %v1371_v63 = vadd.f32 %v1339_v18, %v1247_v46 }
 0x11b   : >> { %v1868_v43 = vmax.f32 %v1852_v2, 0.0 }
 0x11c   : >> { %v1495_v38 = vadd.f32 %v1463_v12, %v1371_v63 }
 0x11d   : >> { %v2186_v21 = vpack.c.bf16 %v1868_v43, %v1868_v43 }
 0x11e   : >> { %v1583_v31 = vadd.f32 %v1567_v17, %v1495_v38 }
 0x11f   : >> { %1951 = vst.msk [vmem:[%s2734_s6 + $0x38] sm:$0xf] %vm234_vm2, %v2186_v21 }
 0x120   : >> { %v1707_v36 = vadd.f32 %v1675_v41, %v1583_v31 }
 0x122   : >> { %v1831_v39 = vadd.f32 %v1799_v44, %v1707_v36 }
 0x124   : >> { %v1853_v22 = vadd.f32 %v2454_v6, %v1831_v39 }
 0x126   : >> { %v1869_v37 = vmax.f32 %v1853_v22, 0.0  ;;  %820 = sbr.rel (!%p818_p5) target bundleno = 109 (0x6d), region = 81 }
 0x128   : >> { %v2187_v27 = vpack.c.bf16 %v1869_v37, %v1869_v37 }
 0x12a   : >> { %1952 = vst.msk [vmem:[%s2734_s6 + $0x3c] sm:$0xf] %vm234_vm2, %v2187_v27 }
 0x12b PF: > { %s13_s14 = sadd.s32 1, %s2308_s14   ;;  %s3202_s12 = smov %s2304_s13 }
 0x12c   : > { %p10_p6 = scmp.ge.s32.totalorder %s13_s14, 4   ;;  %s3203_s13 = smov %s3205_s15 }
 0x12e   :  { %12 = sbr.rel (!%p10_p6) target bundleno = 2 (0x2), region = 92 }

</bundles_post_ra>
